<compile_context>
chip_gen: v7x
topology: tpu7x:2x2x1
jax: 0.10.0
libtpu: 0.0.40
codegen_flags: <defaults>
</compile_context>

<pallas_src>
import jax
import jax.numpy as jnp
import numpy as np
from jax.experimental import pallas as pl
from jax.experimental.pallas import tpu as pltpu

# ---------------------------------------------------------------------------
# Small, module-consistent shapes
# ---------------------------------------------------------------------------
VOCAB = 50                 # len(TEXT.vocab)
EMBED = 32                 # TEXT.vocab.vectors.size(1)
C = 128                    # conv output channels (c = 128 in the module)
K = 5                      # kernel_size
PAD = 2                    # padding=2 in the module
B = 2                      # batch
L = 16                     # sequence length
LABEL_SIZES = (6, 4, 10)   # len(LABEL[i].vocab) for the 3 heads
NUM_BRANCHES = 3

L_PAD = L + 2 * PAD        # 20
L_OUT = L_PAD - K + 1      # 16 (stride=1, "same" length)
KE = K * EMBED             # 160
C3 = NUM_BRANCHES * C      # 384  (3 conv branches folded into the MXU N dim)
N_TOT = sum(LABEL_SIZES)   # 20
N_PAD = 128                # lane-dense padded width of the fused FC output


# ---------------------------------------------------------------------------
# Fused kernel: embedding gather + pad + conv(+bias+ReLU) + max-pool + FC heads
# ---------------------------------------------------------------------------
def fused_cnn_kernel(tokens_ref, emb_ref, wcol_ref, wfc_ref, bias_ref,
                     out_ref, xpad_ref):
    # tokens : SMEM (B, L) int32
    # emb    : VMEM (VOCAB, E) f32           embedding table
    # wcol   : VMEM (K*E, 3*C) bf16          all 3 conv branches side by side
    # wfc    : VMEM (3*C, N_PAD) bf16        block-diagonal fused FC weights
    # bias   : VMEM (1, 3*C + N_PAD) f32     [conv biases | FC biases (0-padded)]
    # out    : VMEM (B, N_PAD) f32           lane-dense fused logits
    # xpad   : VMEM scratch (B*L_PAD, E) f32 zero-padded embedded activations

    # Zero the scratch -> gives the Conv1d padding=2 rows for free.
    xpad_ref[...] = jnp.zeros_like(xpad_ref)

    # Embedding gather: B*L dynamic row reads of the VMEM table (token index
    # comes from SMEM), written at static row offsets into the padded buffer.
    for b in range(B):
        for l in range(L):
            tok = tokens_ref[b, l]
            row = b * L_PAD + PAD + l
            xpad_ref[row:row + 1, :] = emb_ref[pl.ds(tok, 1), :]

    # Conv1d(E -> 3*C, K=5, stride=1, pad=2) as K accumulated MXU matmuls over
    # shifted slices of the padded activations (bf16 operands, f32 accum).
    acc = jnp.zeros((B * L_OUT, C3), jnp.float32)
    for k in range(K):
        xk = jnp.concatenate(
            [xpad_ref[b * L_PAD + k:b * L_PAD + k + L_OUT, :]
             for b in range(B)], axis=0)                       # (B*L_OUT, E) f32
        acc += jnp.dot(xk.astype(jnp.bfloat16),
                       wcol_ref[k * EMBED:(k + 1) * EMBED, :],
                       preferred_element_type=jnp.float32)     # (B*L_OUT, 3*C)

    # Bias + ReLU, kept in f32 (v5e VPU has no bf16 elementwise).
    h = jnp.maximum(acc + bias_ref[:, :C3], 0.0)               # (B*L_OUT, 3*C)

    # Global max-pool over the length axis: one clean cross-sublane reduction.
    pooled = h.reshape(B, L_OUT, C3).max(axis=1)               # (B, 3*C)

    # TODO(synk): F.dropout is stochastic; applied as identity (inference).

    # Fused block-diagonal FC heads -> single lane-dense (B, 128) store.
    out_ref[...] = (
        jnp.dot(pooled.astype(jnp.bfloat16), wfc_ref[...],
                preferred_element_type=jnp.float32)
        + bias_ref[:, C3:]
    )


def fused_forward_call(tokens, emb, w_col, w_fc, biases):
    vmem = pl.BlockSpec(memory_space=pltpu.MemorySpace.VMEM)
    smem = pl.BlockSpec(memory_space=pltpu.MemorySpace.SMEM)
    return pl.pallas_call(
        fused_cnn_kernel,
        out_shape=jax.ShapeDtypeStruct((B, N_PAD), jnp.float32),
        in_specs=[smem, vmem, vmem, vmem, vmem],
        out_specs=pl.BlockSpec(memory_space=pltpu.MemorySpace.VMEM),
        scratch_shapes=[pltpu.VMEM((B * L_PAD, EMBED), jnp.float32)],
    )(tokens, emb, w_col, w_fc, biases)


def cnn_forward(tokens, emb, w_col, w_fc, biases):
    """Entire forward = one fused pallas_call.  Returns the lane-dense (B,128)
    logits slab; heads are the slices [:,0:6], [:,6:10], [:,10:20], taken
    where they are consumed (avoids extra tiny HLO slice ops)."""
    return fused_forward_call(tokens, emb, w_col, w_fc, biases)


# ---------------------------------------------------------------------------
# Parameter init (xavier-normal-like, zero bias) + fused-layout packing
# ---------------------------------------------------------------------------
def init_params(key):
    ks = jax.random.split(key, 2 + NUM_BRANCHES)
    # Embedding table (stands in for TEXT.vocab.vectors, frozen).
    emb = jax.random.normal(ks[0], (VOCAB, EMBED), jnp.float32)
    # Conv weights, layout (branch, K, E, C); xavier-normal-like scale.
    conv_std = (2.0 / (EMBED * K + C * K)) ** 0.5
    conv_w = jax.random.normal(
        ks[1], (NUM_BRANCHES, K, EMBED, C), jnp.float32) * conv_std
    conv_b = jnp.zeros((NUM_BRANCHES, C), jnp.float32)
    # FC heads: xavier-normal weights, zero bias.
    fc_ws, fc_bs = [], []
    for i, n in enumerate(LABEL_SIZES):
        std = (2.0 / (C + n)) ** 0.5
        fc_ws.append(jax.random.normal(ks[2 + i], (C, n), jnp.float32) * std)
        fc_bs.append(jnp.zeros((n,), jnp.float32))
    return emb, conv_w, conv_b, fc_ws, fc_bs


def pack_params(conv_w, conv_b, fc_ws, fc_bs):
    """Repack params into the fused-kernel layouts (done once, outside forward)."""
    # Conv: fold branches into N and K taps into the contraction dim; bf16 MXU.
    # w_col[k*E + e, nb*C + c] = conv_w[nb, k, e, c]
    w_col = jnp.transpose(conv_w, (1, 2, 0, 3)).reshape(KE, C3)
    # FC heads as one block-diagonal matmul, output lane-padded to 128.
    w_bd = jnp.zeros((C3, N_PAD), jnp.float32)
    # Single packed bias buffer: [conv biases (384) | FC biases padded to 128].
    bias = jnp.zeros((1, C3 + N_PAD), jnp.float32)
    bias = bias.at[0, :C3].set(conv_b.reshape(C3))
    off = 0
    for i, n in enumerate(LABEL_SIZES):
        w_bd = w_bd.at[i * C:(i + 1) * C, off:off + n].set(fc_ws[i])
        bias = bias.at[0, C3 + off:C3 + off + n].set(fc_bs[i])
        off += n
    return w_col.astype(jnp.bfloat16), w_bd.astype(jnp.bfloat16), bias


# ---------------------------------------------------------------------------
# Pure-JAX reference (same packed weights, f32 math) for a sanity check
# ---------------------------------------------------------------------------
def reference_forward(tokens, emb, w_col, w_fc, biases):
    x = jnp.take(emb, tokens, axis=0)                        # (B, L, E)
    x_pad = jnp.pad(x, ((0, 0), (PAD, PAD), (0, 0)))
    x_col = jnp.concatenate([x_pad[:, k:k + L_OUT, :] for k in range(K)],
                            axis=-1).reshape(B * L_OUT, KE)
    h = jnp.maximum(x_col @ w_col.astype(jnp.float32) + biases[:, :C3], 0.0)
    pooled = h.reshape(B, L_OUT, C3).max(axis=1)
    return pooled @ w_fc.astype(jnp.float32) + biases[:, C3:]


if __name__ == "__main__":
    key = jax.random.PRNGKey(0)
    pkey, tkey = jax.random.split(key)

    emb, conv_w, conv_b, fc_ws, fc_bs = init_params(pkey)
    w_col, w_fc, biases = pack_params(conv_w, conv_b, fc_ws, fc_bs)
    tokens = jax.random.randint(tkey, (B, L), 0, VOCAB, dtype=jnp.int32)

    forward = jax.jit(cnn_forward)
    out_pad = forward(tokens, emb, w_col, w_fc, biases)       # (B, 128)
    jax.block_until_ready(out_pad)

    # Numerical sanity check (bf16 MXU operands vs f32 reference).
    ref = reference_forward(tokens, emb, w_col, w_fc, biases)
    np.testing.assert_allclose(np.asarray(out_pad)[:, :N_TOT],
                               np.asarray(ref)[:, :N_TOT],
                               rtol=5e-2, atol=5e-2)

    # Per-head logits, sliced where consumed (outside the kernel/jit).
    outs, off = [], 0
    for n in LABEL_SIZES:
        outs.append(out_pad[:, off:off + n])
        off += n
    assert [tuple(o.shape) for o in outs] == [(B, n) for n in LABEL_SIZES]
    print("KERNEL_OK")
</pallas_src>

<mosaic_0001>
module attributes {stable_mosaic.version = 11 : i64} {
  func.func @fused_cnn_kernel(%arg0: memref<2x16xi32, #tpu.memory_space<smem>>, %arg1: memref<50x32xf32, #tpu.memory_space<vmem>>, %arg2: memref<160x384xbf16, #tpu.memory_space<vmem>>, %arg3: memref<384x128xbf16, #tpu.memory_space<vmem>>, %arg4: memref<1x512xf32, #tpu.memory_space<vmem>>, %arg5: memref<2x128xf32, #tpu.memory_space<vmem>>, %arg6: memref<40x32xf32, #tpu.memory_space<vmem>>) attributes {dimension_semantics = [], scalar_prefetch = 0 : i64, scratch_operands = 1 : i64, tpu.core_type = #tpu.core_type<tc>} {
    %cst = arith.constant 0.000000e+00 : f32
    %0 = vector.broadcast %cst : f32 to vector<40x32xf32>
    %c0 = arith.constant 0 : index
    %c0_0 = arith.constant 0 : index
    %1 = vector.load %arg6[%c0, %c0_0] : memref<40x32xf32, #tpu.memory_space<vmem>>, vector<40x32xf32>
    tpu.vector_store %arg6[%c0, %c0_0], %0 {strides = array<i32>} : memref<40x32xf32, #tpu.memory_space<vmem>>, vector<40x32xf32>,
    %c0_1 = arith.constant 0 : index
    %c0_2 = arith.constant 0 : index
    %2 = memref.load %arg0[%c0_1, %c0_2] : memref<2x16xi32, #tpu.memory_space<smem>>
    %3 = arith.index_cast %2 : i32 to index
    %c0_3 = arith.constant 0 : index
    %4 = vector.load %arg1[%3, %c0_3] : memref<50x32xf32, #tpu.memory_space<vmem>>, vector<1x32xf32>
    %c2 = arith.constant 2 : index
    %c0_4 = arith.constant 0 : index
    %5 = vector.load %arg6[%c2, %c0_4] : memref<40x32xf32, #tpu.memory_space<vmem>>, vector<1x32xf32>
    tpu.vector_store %arg6[%c2, %c0_4], %4 {strides = array<i32>} : memref<40x32xf32, #tpu.memory_space<vmem>>, vector<1x32xf32>,
    %c0_5 = arith.constant 0 : index
    %c1 = arith.constant 1 : index
    %6 = memref.load %arg0[%c0_5, %c1] : memref<2x16xi32, #tpu.memory_space<smem>>
    %7 = arith.index_cast %6 : i32 to index
    %c0_6 = arith.constant 0 : index
    %8 = vector.load %arg1[%7, %c0_6] : memref<50x32xf32, #tpu.memory_space<vmem>>, vector<1x32xf32>
    %c3 = arith.constant 3 : index
    %c0_7 = arith.constant 0 : index
    %9 = vector.load %arg6[%c3, %c0_7] : memref<40x32xf32, #tpu.memory_space<vmem>>, vector<1x32xf32>
    tpu.vector_store %arg6[%c3, %c0_7], %8 {strides = array<i32>} : memref<40x32xf32, #tpu.memory_space<vmem>>, vector<1x32xf32>,
    %c0_8 = arith.constant 0 : index
    %c2_9 = arith.constant 2 : index
    %10 = memref.load %arg0[%c0_8, %c2_9] : memref<2x16xi32, #tpu.memory_space<smem>>
    %11 = arith.index_cast %10 : i32 to index
    %c0_10 = arith.constant 0 : index
    %12 = vector.load %arg1[%11, %c0_10] : memref<50x32xf32, #tpu.memory_space<vmem>>, vector<1x32xf32>
    %c4 = arith.constant 4 : index
    %c0_11 = arith.constant 0 : index
    %13 = vector.load %arg6[%c4, %c0_11] : memref<40x32xf32, #tpu.memory_space<vmem>>, vector<1x32xf32>
    tpu.vector_store %arg6[%c4, %c0_11], %12 {strides = array<i32>} : memref<40x32xf32, #tpu.memory_space<vmem>>, vector<1x32xf32>,
    %c0_12 = arith.constant 0 : index
    %c3_13 = arith.constant 3 : index
    %14 = memref.load %arg0[%c0_12, %c3_13] : memref<2x16xi32, #tpu.memory_space<smem>>
    %15 = arith.index_cast %14 : i32 to index
    %c0_14 = arith.constant 0 : index
    %16 = vector.load %arg1[%15, %c0_14] : memref<50x32xf32, #tpu.memory_space<vmem>>, vector<1x32xf32>
    %c5 = arith.constant 5 : index
    %c0_15 = arith.constant 0 : index
    %17 = vector.load %arg6[%c5, %c0_15] : memref<40x32xf32, #tpu.memory_space<vmem>>, vector<1x32xf32>
    tpu.vector_store %arg6[%c5, %c0_15], %16 {strides = array<i32>} : memref<40x32xf32, #tpu.memory_space<vmem>>, vector<1x32xf32>,
    %c0_16 = arith.constant 0 : index
    %c4_17 = arith.constant 4 : index
    %18 = memref.load %arg0[%c0_16, %c4_17] : memref<2x16xi32, #tpu.memory_space<smem>>
    %19 = arith.index_cast %18 : i32 to index
    %c0_18 = arith.constant 0 : index
    %20 = vector.load %arg1[%19, %c0_18] : memref<50x32xf32, #tpu.memory_space<vmem>>, vector<1x32xf32>
    %c6 = arith.constant 6 : index
    %c0_19 = arith.constant 0 : index
    %21 = vector.load %arg6[%c6, %c0_19] : memref<40x32xf32, #tpu.memory_space<vmem>>, vector<1x32xf32>
    tpu.vector_store %arg6[%c6, %c0_19], %20 {strides = array<i32>} : memref<40x32xf32, #tpu.memory_space<vmem>>, vector<1x32xf32>,
    %c0_20 = arith.constant 0 : index
    %c5_21 = arith.constant 5 : index
    %22 = memref.load %arg0[%c0_20, %c5_21] : memref<2x16xi32, #tpu.memory_space<smem>>
    %23 = arith.index_cast %22 : i32 to index
    %c0_22 = arith.constant 0 : index
    %24 = vector.load %arg1[%23, %c0_22] : memref<50x32xf32, #tpu.memory_space<vmem>>, vector<1x32xf32>
    %c7 = arith.constant 7 : index
    %c0_23 = arith.constant 0 : index
    %25 = vector.load %arg6[%c7, %c0_23] : memref<40x32xf32, #tpu.memory_space<vmem>>, vector<1x32xf32>
    tpu.vector_store %arg6[%c7, %c0_23], %24 {strides = array<i32>} : memref<40x32xf32, #tpu.memory_space<vmem>>, vector<1x32xf32>,
    %c0_24 = arith.constant 0 : index
    %c6_25 = arith.constant 6 : index
    %26 = memref.load %arg0[%c0_24, %c6_25] : memref<2x16xi32, #tpu.memory_space<smem>>
    %27 = arith.index_cast %26 : i32 to index
    %c0_26 = arith.constant 0 : index
    %28 = vector.load %arg1[%27, %c0_26] : memref<50x32xf32, #tpu.memory_space<vmem>>, vector<1x32xf32>
    %c8 = arith.constant 8 : index
    %c0_27 = arith.constant 0 : index
    %29 = vector.load %arg6[%c8, %c0_27] : memref<40x32xf32, #tpu.memory_space<vmem>>, vector<1x32xf32>
    tpu.vector_store %arg6[%c8, %c0_27], %28 {strides = array<i32>} : memref<40x32xf32, #tpu.memory_space<vmem>>, vector<1x32xf32>,
    %c0_28 = arith.constant 0 : index
    %c7_29 = arith.constant 7 : index
    %30 = memref.load %arg0[%c0_28, %c7_29] : memref<2x16xi32, #tpu.memory_space<smem>>
    %31 = arith.index_cast %30 : i32 to index
    %c0_30 = arith.constant 0 : index
    %32 = vector.load %arg1[%31, %c0_30] : memref<50x32xf32, #tpu.memory_space<vmem>>, vector<1x32xf32>
    %c9 = arith.constant 9 : index
    %c0_31 = arith.constant 0 : index
    %33 = vector.load %arg6[%c9, %c0_31] : memref<40x32xf32, #tpu.memory_space<vmem>>, vector<1x32xf32>
    tpu.vector_store %arg6[%c9, %c0_31], %32 {strides = array<i32>} : memref<40x32xf32, #tpu.memory_space<vmem>>, vector<1x32xf32>,
    %c0_32 = arith.constant 0 : index
    %c8_33 = arith.constant 8 : index
    %34 = memref.load %arg0[%c0_32, %c8_33] : memref<2x16xi32, #tpu.memory_space<smem>>
    %35 = arith.index_cast %34 : i32 to index
    %c0_34 = arith.constant 0 : index
    %36 = vector.load %arg1[%35, %c0_34] : memref<50x32xf32, #tpu.memory_space<vmem>>, vector<1x32xf32>
    %c10 = arith.constant 10 : index
    %c0_35 = arith.constant 0 : index
    %37 = vector.load %arg6[%c10, %c0_35] : memref<40x32xf32, #tpu.memory_space<vmem>>, vector<1x32xf32>
    tpu.vector_store %arg6[%c10, %c0_35], %36 {strides = array<i32>} : memref<40x32xf32, #tpu.memory_space<vmem>>, vector<1x32xf32>,
    %c0_36 = arith.constant 0 : index
    %c9_37 = arith.constant 9 : index
    %38 = memref.load %arg0[%c0_36, %c9_37] : memref<2x16xi32, #tpu.memory_space<smem>>
    %39 = arith.index_cast %38 : i32 to index
    %c0_38 = arith.constant 0 : index
    %40 = vector.load %arg1[%39, %c0_38] : memref<50x32xf32, #tpu.memory_space<vmem>>, vector<1x32xf32>
    %c11 = arith.constant 11 : index
    %c0_39 = arith.constant 0 : index
    %41 = vector.load %arg6[%c11, %c0_39] : memref<40x32xf32, #tpu.memory_space<vmem>>, vector<1x32xf32>
    tpu.vector_store %arg6[%c11, %c0_39], %40 {strides = array<i32>} : memref<40x32xf32, #tpu.memory_space<vmem>>, vector<1x32xf32>,
    %c0_40 = arith.constant 0 : index
    %c10_41 = arith.constant 10 : index
    %42 = memref.load %arg0[%c0_40, %c10_41] : memref<2x16xi32, #tpu.memory_space<smem>>
    %43 = arith.index_cast %42 : i32 to index
    %c0_42 = arith.constant 0 : index
    %44 = vector.load %arg1[%43, %c0_42] : memref<50x32xf32, #tpu.memory_space<vmem>>, vector<1x32xf32>
    %c12 = arith.constant 12 : index
    %c0_43 = arith.constant 0 : index
    %45 = vector.load %arg6[%c12, %c0_43] : memref<40x32xf32, #tpu.memory_space<vmem>>, vector<1x32xf32>
    tpu.vector_store %arg6[%c12, %c0_43], %44 {strides = array<i32>} : memref<40x32xf32, #tpu.memory_space<vmem>>, vector<1x32xf32>,
    %c0_44 = arith.constant 0 : index
    %c11_45 = arith.constant 11 : index
    %46 = memref.load %arg0[%c0_44, %c11_45] : memref<2x16xi32, #tpu.memory_space<smem>>
    %47 = arith.index_cast %46 : i32 to index
    %c0_46 = arith.constant 0 : index
    %48 = vector.load %arg1[%47, %c0_46] : memref<50x32xf32, #tpu.memory_space<vmem>>, vector<1x32xf32>
    %c13 = arith.constant 13 : index
    %c0_47 = arith.constant 0 : index
    %49 = vector.load %arg6[%c13, %c0_47] : memref<40x32xf32, #tpu.memory_space<vmem>>, vector<1x32xf32>
    tpu.vector_store %arg6[%c13, %c0_47], %48 {strides = array<i32>} : memref<40x32xf32, #tpu.memory_space<vmem>>, vector<1x32xf32>,
    %c0_48 = arith.constant 0 : index
    %c12_49 = arith.constant 12 : index
    %50 = memref.load %arg0[%c0_48, %c12_49] : memref<2x16xi32, #tpu.memory_space<smem>>
    %51 = arith.index_cast %50 : i32 to index
    %c0_50 = arith.constant 0 : index
    %52 = vector.load %arg1[%51, %c0_50] : memref<50x32xf32, #tpu.memory_space<vmem>>, vector<1x32xf32>
    %c14 = arith.constant 14 : index
    %c0_51 = arith.constant 0 : index
    %53 = vector.load %arg6[%c14, %c0_51] : memref<40x32xf32, #tpu.memory_space<vmem>>, vector<1x32xf32>
    tpu.vector_store %arg6[%c14, %c0_51], %52 {strides = array<i32>} : memref<40x32xf32, #tpu.memory_space<vmem>>, vector<1x32xf32>,
    %c0_52 = arith.constant 0 : index
    %c13_53 = arith.constant 13 : index
    %54 = memref.load %arg0[%c0_52, %c13_53] : memref<2x16xi32, #tpu.memory_space<smem>>
    %55 = arith.index_cast %54 : i32 to index
    %c0_54 = arith.constant 0 : index
    %56 = vector.load %arg1[%55, %c0_54] : memref<50x32xf32, #tpu.memory_space<vmem>>, vector<1x32xf32>
    %c15 = arith.constant 15 : index
    %c0_55 = arith.constant 0 : index
    %57 = vector.load %arg6[%c15, %c0_55] : memref<40x32xf32, #tpu.memory_space<vmem>>, vector<1x32xf32>
    tpu.vector_store %arg6[%c15, %c0_55], %56 {strides = array<i32>} : memref<40x32xf32, #tpu.memory_space<vmem>>, vector<1x32xf32>,
    %c0_56 = arith.constant 0 : index
    %c14_57 = arith.constant 14 : index
    %58 = memref.load %arg0[%c0_56, %c14_57] : memref<2x16xi32, #tpu.memory_space<smem>>
    %59 = arith.index_cast %58 : i32 to index
    %c0_58 = arith.constant 0 : index
    %60 = vector.load %arg1[%59, %c0_58] : memref<50x32xf32, #tpu.memory_space<vmem>>, vector<1x32xf32>
    %c16 = arith.constant 16 : index
    %c0_59 = arith.constant 0 : index
    %61 = vector.load %arg6[%c16, %c0_59] : memref<40x32xf32, #tpu.memory_space<vmem>>, vector<1x32xf32>
    tpu.vector_store %arg6[%c16, %c0_59], %60 {strides = array<i32>} : memref<40x32xf32, #tpu.memory_space<vmem>>, vector<1x32xf32>,
    %c0_60 = arith.constant 0 : index
    %c15_61 = arith.constant 15 : index
    %62 = memref.load %arg0[%c0_60, %c15_61] : memref<2x16xi32, #tpu.memory_space<smem>>
    %63 = arith.index_cast %62 : i32 to index
    %c0_62 = arith.constant 0 : index
    %64 = vector.load %arg1[%63, %c0_62] : memref<50x32xf32, #tpu.memory_space<vmem>>, vector<1x32xf32>
    %c17 = arith.constant 17 : index
    %c0_63 = arith.constant 0 : index
    %65 = vector.load %arg6[%c17, %c0_63] : memref<40x32xf32, #tpu.memory_space<vmem>>, vector<1x32xf32>
    tpu.vector_store %arg6[%c17, %c0_63], %64 {strides = array<i32>} : memref<40x32xf32, #tpu.memory_space<vmem>>, vector<1x32xf32>,
    %c1_64 = arith.constant 1 : index
    %c0_65 = arith.constant 0 : index
    %66 = memref.load %arg0[%c1_64, %c0_65] : memref<2x16xi32, #tpu.memory_space<smem>>
    %67 = arith.index_cast %66 : i32 to index
    %c0_66 = arith.constant 0 : index
    %68 = vector.load %arg1[%67, %c0_66] : memref<50x32xf32, #tpu.memory_space<vmem>>, vector<1x32xf32>
    %c22 = arith.constant 22 : index
    %c0_67 = arith.constant 0 : index
    %69 = vector.load %arg6[%c22, %c0_67] : memref<40x32xf32, #tpu.memory_space<vmem>>, vector<1x32xf32>
    tpu.vector_store %arg6[%c22, %c0_67], %68 {strides = array<i32>} : memref<40x32xf32, #tpu.memory_space<vmem>>, vector<1x32xf32>,
    %c1_68 = arith.constant 1 : index
    %c1_69 = arith.constant 1 : index
    %70 = memref.load %arg0[%c1_68, %c1_69] : memref<2x16xi32, #tpu.memory_space<smem>>
    %71 = arith.index_cast %70 : i32 to index
    %c0_70 = arith.constant 0 : index
    %72 = vector.load %arg1[%71, %c0_70] : memref<50x32xf32, #tpu.memory_space<vmem>>, vector<1x32xf32>
    %c23 = arith.constant 23 : index
    %c0_71 = arith.constant 0 : index
    %73 = vector.load %arg6[%c23, %c0_71] : memref<40x32xf32, #tpu.memory_space<vmem>>, vector<1x32xf32>
    tpu.vector_store %arg6[%c23, %c0_71], %72 {strides = array<i32>} : memref<40x32xf32, #tpu.memory_space<vmem>>, vector<1x32xf32>,
    %c1_72 = arith.constant 1 : index
    %c2_73 = arith.constant 2 : index
    %74 = memref.load %arg0[%c1_72, %c2_73] : memref<2x16xi32, #tpu.memory_space<smem>>
    %75 = arith.index_cast %74 : i32 to index
    %c0_74 = arith.constant 0 : index
    %76 = vector.load %arg1[%75, %c0_74] : memref<50x32xf32, #tpu.memory_space<vmem>>, vector<1x32xf32>
    %c24 = arith.constant 24 : index
    %c0_75 = arith.constant 0 : index
    %77 = vector.load %arg6[%c24, %c0_75] : memref<40x32xf32, #tpu.memory_space<vmem>>, vector<1x32xf32>
    tpu.vector_store %arg6[%c24, %c0_75], %76 {strides = array<i32>} : memref<40x32xf32, #tpu.memory_space<vmem>>, vector<1x32xf32>,
    %c1_76 = arith.constant 1 : index
    %c3_77 = arith.constant 3 : index
    %78 = memref.load %arg0[%c1_76, %c3_77] : memref<2x16xi32, #tpu.memory_space<smem>>
    %79 = arith.index_cast %78 : i32 to index
    %c0_78 = arith.constant 0 : index
    %80 = vector.load %arg1[%79, %c0_78] : memref<50x32xf32, #tpu.memory_space<vmem>>, vector<1x32xf32>
    %c25 = arith.constant 25 : index
    %c0_79 = arith.constant 0 : index
    %81 = vector.load %arg6[%c25, %c0_79] : memref<40x32xf32, #tpu.memory_space<vmem>>, vector<1x32xf32>
    tpu.vector_store %arg6[%c25, %c0_79], %80 {strides = array<i32>} : memref<40x32xf32, #tpu.memory_space<vmem>>, vector<1x32xf32>,
    %c1_80 = arith.constant 1 : index
    %c4_81 = arith.constant 4 : index
    %82 = memref.load %arg0[%c1_80, %c4_81] : memref<2x16xi32, #tpu.memory_space<smem>>
    %83 = arith.index_cast %82 : i32 to index
    %c0_82 = arith.constant 0 : index
    %84 = vector.load %arg1[%83, %c0_82] : memref<50x32xf32, #tpu.memory_space<vmem>>, vector<1x32xf32>
    %c26 = arith.constant 26 : index
    %c0_83 = arith.constant 0 : index
    %85 = vector.load %arg6[%c26, %c0_83] : memref<40x32xf32, #tpu.memory_space<vmem>>, vector<1x32xf32>
    tpu.vector_store %arg6[%c26, %c0_83], %84 {strides = array<i32>} : memref<40x32xf32, #tpu.memory_space<vmem>>, vector<1x32xf32>,
    %c1_84 = arith.constant 1 : index
    %c5_85 = arith.constant 5 : index
    %86 = memref.load %arg0[%c1_84, %c5_85] : memref<2x16xi32, #tpu.memory_space<smem>>
    %87 = arith.index_cast %86 : i32 to index
    %c0_86 = arith.constant 0 : index
    %88 = vector.load %arg1[%87, %c0_86] : memref<50x32xf32, #tpu.memory_space<vmem>>, vector<1x32xf32>
    %c27 = arith.constant 27 : index
    %c0_87 = arith.constant 0 : index
    %89 = vector.load %arg6[%c27, %c0_87] : memref<40x32xf32, #tpu.memory_space<vmem>>, vector<1x32xf32>
    tpu.vector_store %arg6[%c27, %c0_87], %88 {strides = array<i32>} : memref<40x32xf32, #tpu.memory_space<vmem>>, vector<1x32xf32>,
    %c1_88 = arith.constant 1 : index
    %c6_89 = arith.constant 6 : index
    %90 = memref.load %arg0[%c1_88, %c6_89] : memref<2x16xi32, #tpu.memory_space<smem>>
    %91 = arith.index_cast %90 : i32 to index
    %c0_90 = arith.constant 0 : index
    %92 = vector.load %arg1[%91, %c0_90] : memref<50x32xf32, #tpu.memory_space<vmem>>, vector<1x32xf32>
    %c28 = arith.constant 28 : index
    %c0_91 = arith.constant 0 : index
    %93 = vector.load %arg6[%c28, %c0_91] : memref<40x32xf32, #tpu.memory_space<vmem>>, vector<1x32xf32>
    tpu.vector_store %arg6[%c28, %c0_91], %92 {strides = array<i32>} : memref<40x32xf32, #tpu.memory_space<vmem>>, vector<1x32xf32>,
    %c1_92 = arith.constant 1 : index
    %c7_93 = arith.constant 7 : index
    %94 = memref.load %arg0[%c1_92, %c7_93] : memref<2x16xi32, #tpu.memory_space<smem>>
    %95 = arith.index_cast %94 : i32 to index
    %c0_94 = arith.constant 0 : index
    %96 = vector.load %arg1[%95, %c0_94] : memref<50x32xf32, #tpu.memory_space<vmem>>, vector<1x32xf32>
    %c29 = arith.constant 29 : index
    %c0_95 = arith.constant 0 : index
    %97 = vector.load %arg6[%c29, %c0_95] : memref<40x32xf32, #tpu.memory_space<vmem>>, vector<1x32xf32>
    tpu.vector_store %arg6[%c29, %c0_95], %96 {strides = array<i32>} : memref<40x32xf32, #tpu.memory_space<vmem>>, vector<1x32xf32>,
    %c1_96 = arith.constant 1 : index
    %c8_97 = arith.constant 8 : index
    %98 = memref.load %arg0[%c1_96, %c8_97] : memref<2x16xi32, #tpu.memory_space<smem>>
    %99 = arith.index_cast %98 : i32 to index
    %c0_98 = arith.constant 0 : index
    %100 = vector.load %arg1[%99, %c0_98] : memref<50x32xf32, #tpu.memory_space<vmem>>, vector<1x32xf32>
    %c30 = arith.constant 30 : index
    %c0_99 = arith.constant 0 : index
    %101 = vector.load %arg6[%c30, %c0_99] : memref<40x32xf32, #tpu.memory_space<vmem>>, vector<1x32xf32>
    tpu.vector_store %arg6[%c30, %c0_99], %100 {strides = array<i32>} : memref<40x32xf32, #tpu.memory_space<vmem>>, vector<1x32xf32>,
    %c1_100 = arith.constant 1 : index
    %c9_101 = arith.constant 9 : index
    %102 = memref.load %arg0[%c1_100, %c9_101] : memref<2x16xi32, #tpu.memory_space<smem>>
    %103 = arith.index_cast %102 : i32 to index
    %c0_102 = arith.constant 0 : index
    %104 = vector.load %arg1[%103, %c0_102] : memref<50x32xf32, #tpu.memory_space<vmem>>, vector<1x32xf32>
    %c31 = arith.constant 31 : index
    %c0_103 = arith.constant 0 : index
    %105 = vector.load %arg6[%c31, %c0_103] : memref<40x32xf32, #tpu.memory_space<vmem>>, vector<1x32xf32>
    tpu.vector_store %arg6[%c31, %c0_103], %104 {strides = array<i32>} : memref<40x32xf32, #tpu.memory_space<vmem>>, vector<1x32xf32>,
    %c1_104 = arith.constant 1 : index
    %c10_105 = arith.constant 10 : index
    %106 = memref.load %arg0[%c1_104, %c10_105] : memref<2x16xi32, #tpu.memory_space<smem>>
    %107 = arith.index_cast %106 : i32 to index
    %c0_106 = arith.constant 0 : index
    %108 = vector.load %arg1[%107, %c0_106] : memref<50x32xf32, #tpu.memory_space<vmem>>, vector<1x32xf32>
    %c32 = arith.constant 32 : index
    %c0_107 = arith.constant 0 : index
    %109 = vector.load %arg6[%c32, %c0_107] : memref<40x32xf32, #tpu.memory_space<vmem>>, vector<1x32xf32>
    tpu.vector_store %arg6[%c32, %c0_107], %108 {strides = array<i32>} : memref<40x32xf32, #tpu.memory_space<vmem>>, vector<1x32xf32>,
    %c1_108 = arith.constant 1 : index
    %c11_109 = arith.constant 11 : index
    %110 = memref.load %arg0[%c1_108, %c11_109] : memref<2x16xi32, #tpu.memory_space<smem>>
    %111 = arith.index_cast %110 : i32 to index
    %c0_110 = arith.constant 0 : index
    %112 = vector.load %arg1[%111, %c0_110] : memref<50x32xf32, #tpu.memory_space<vmem>>, vector<1x32xf32>
    %c33 = arith.constant 33 : index
    %c0_111 = arith.constant 0 : index
    %113 = vector.load %arg6[%c33, %c0_111] : memref<40x32xf32, #tpu.memory_space<vmem>>, vector<1x32xf32>
    tpu.vector_store %arg6[%c33, %c0_111], %112 {strides = array<i32>} : memref<40x32xf32, #tpu.memory_space<vmem>>, vector<1x32xf32>,
    %c1_112 = arith.constant 1 : index
    %c12_113 = arith.constant 12 : index
    %114 = memref.load %arg0[%c1_112, %c12_113] : memref<2x16xi32, #tpu.memory_space<smem>>
    %115 = arith.index_cast %114 : i32 to index
    %c0_114 = arith.constant 0 : index
    %116 = vector.load %arg1[%115, %c0_114] : memref<50x32xf32, #tpu.memory_space<vmem>>, vector<1x32xf32>
    %c34 = arith.constant 34 : index
    %c0_115 = arith.constant 0 : index
    %117 = vector.load %arg6[%c34, %c0_115] : memref<40x32xf32, #tpu.memory_space<vmem>>, vector<1x32xf32>
    tpu.vector_store %arg6[%c34, %c0_115], %116 {strides = array<i32>} : memref<40x32xf32, #tpu.memory_space<vmem>>, vector<1x32xf32>,
    %c1_116 = arith.constant 1 : index
    %c13_117 = arith.constant 13 : index
    %118 = memref.load %arg0[%c1_116, %c13_117] : memref<2x16xi32, #tpu.memory_space<smem>>
    %119 = arith.index_cast %118 : i32 to index
    %c0_118 = arith.constant 0 : index
    %120 = vector.load %arg1[%119, %c0_118] : memref<50x32xf32, #tpu.memory_space<vmem>>, vector<1x32xf32>
    %c35 = arith.constant 35 : index
    %c0_119 = arith.constant 0 : index
    %121 = vector.load %arg6[%c35, %c0_119] : memref<40x32xf32, #tpu.memory_space<vmem>>, vector<1x32xf32>
    tpu.vector_store %arg6[%c35, %c0_119], %120 {strides = array<i32>} : memref<40x32xf32, #tpu.memory_space<vmem>>, vector<1x32xf32>,
    %c1_120 = arith.constant 1 : index
    %c14_121 = arith.constant 14 : index
    %122 = memref.load %arg0[%c1_120, %c14_121] : memref<2x16xi32, #tpu.memory_space<smem>>
    %123 = arith.index_cast %122 : i32 to index
    %c0_122 = arith.constant 0 : index
    %124 = vector.load %arg1[%123, %c0_122] : memref<50x32xf32, #tpu.memory_space<vmem>>, vector<1x32xf32>
    %c36 = arith.constant 36 : index
    %c0_123 = arith.constant 0 : index
    %125 = vector.load %arg6[%c36, %c0_123] : memref<40x32xf32, #tpu.memory_space<vmem>>, vector<1x32xf32>
    tpu.vector_store %arg6[%c36, %c0_123], %124 {strides = array<i32>} : memref<40x32xf32, #tpu.memory_space<vmem>>, vector<1x32xf32>,
    %c1_124 = arith.constant 1 : index
    %c15_125 = arith.constant 15 : index
    %126 = memref.load %arg0[%c1_124, %c15_125] : memref<2x16xi32, #tpu.memory_space<smem>>
    %127 = arith.index_cast %126 : i32 to index
    %c0_126 = arith.constant 0 : index
    %128 = vector.load %arg1[%127, %c0_126] : memref<50x32xf32, #tpu.memory_space<vmem>>, vector<1x32xf32>
    %c37 = arith.constant 37 : index
    %c0_127 = arith.constant 0 : index
    %129 = vector.load %arg6[%c37, %c0_127] : memref<40x32xf32, #tpu.memory_space<vmem>>, vector<1x32xf32>
    tpu.vector_store %arg6[%c37, %c0_127], %128 {strides = array<i32>} : memref<40x32xf32, #tpu.memory_space<vmem>>, vector<1x32xf32>,
    %cst_128 = arith.constant 0.000000e+00 : f32
    %130 = vector.broadcast %cst_128 : f32 to vector<32x384xf32>
    %c0_129 = arith.constant 0 : index
    %c0_130 = arith.constant 0 : index
    %131 = vector.load %arg6[%c0_129, %c0_130] : memref<40x32xf32, #tpu.memory_space<vmem>>, vector<16x32xf32>
    %c20 = arith.constant 20 : index
    %c0_131 = arith.constant 0 : index
    %132 = vector.load %arg6[%c20, %c0_131] : memref<40x32xf32, #tpu.memory_space<vmem>>, vector<16x32xf32>
    %133 = tpu.concatenate %131, %132 in 0 : vector<16x32xf32>, vector<16x32xf32> -> vector<32x32xf32>
    %134 = arith.truncf %133 : vector<32x32xf32> to vector<32x32xbf16>
    %c0_132 = arith.constant 0 : index
    %c0_133 = arith.constant 0 : index
    %135 = vector.load %arg2[%c0_132, %c0_133] : memref<160x384xbf16, #tpu.memory_space<vmem>>, vector<32x384xbf16>
    %cst_134 = arith.constant dense<0.000000e+00> : vector<32x384xf32>
    %136 = tpu.matmul %134, %135, %cst_134 {dimension_numbers = #tpu.dot_dimension_numbers<[1], [0], [0], [1], [0, 0, 1, 1], [], []>} : vector<32x32xbf16>, vector<32x384xbf16>, vector<32x384xf32> -> vector<32x384xf32>
    %137 = arith.addf %130, %136 : vector<32x384xf32>
    %c1_135 = arith.constant 1 : index
    %c0_136 = arith.constant 0 : index
    %138 = vector.load %arg6[%c1_135, %c0_136] : memref<40x32xf32, #tpu.memory_space<vmem>>, vector<16x32xf32>
    %c21 = arith.constant 21 : index
    %c0_137 = arith.constant 0 : index
    %139 = vector.load %arg6[%c21, %c0_137] : memref<40x32xf32, #tpu.memory_space<vmem>>, vector<16x32xf32>
    %140 = tpu.concatenate %138, %139 in 0 : vector<16x32xf32>, vector<16x32xf32> -> vector<32x32xf32>
    %141 = arith.truncf %140 : vector<32x32xf32> to vector<32x32xbf16>
    %c32_138 = arith.constant 32 : index
    %c0_139 = arith.constant 0 : index
    %142 = vector.load %arg2[%c32_138, %c0_139] : memref<160x384xbf16, #tpu.memory_space<vmem>>, vector<32x384xbf16>
    %cst_140 = arith.constant dense<0.000000e+00> : vector<32x384xf32>
    %143 = tpu.matmul %141, %142, %cst_140 {dimension_numbers = #tpu.dot_dimension_numbers<[1], [0], [0], [1], [0, 0, 1, 1], [], []>} : vector<32x32xbf16>, vector<32x384xbf16>, vector<32x384xf32> -> vector<32x384xf32>
    %144 = arith.addf %137, %143 : vector<32x384xf32>
    %c2_141 = arith.constant 2 : index
    %c0_142 = arith.constant 0 : index
    %145 = vector.load %arg6[%c2_141, %c0_142] : memref<40x32xf32, #tpu.memory_space<vmem>>, vector<16x32xf32>
    %c22_143 = arith.constant 22 : index
    %c0_144 = arith.constant 0 : index
    %146 = vector.load %arg6[%c22_143, %c0_144] : memref<40x32xf32, #tpu.memory_space<vmem>>, vector<16x32xf32>
    %147 = tpu.concatenate %145, %146 in 0 : vector<16x32xf32>, vector<16x32xf32> -> vector<32x32xf32>
    %148 = arith.truncf %147 : vector<32x32xf32> to vector<32x32xbf16>
    %c64 = arith.constant 64 : index
    %c0_145 = arith.constant 0 : index
    %149 = vector.load %arg2[%c64, %c0_145] : memref<160x384xbf16, #tpu.memory_space<vmem>>, vector<32x384xbf16>
    %cst_146 = arith.constant dense<0.000000e+00> : vector<32x384xf32>
    %150 = tpu.matmul %148, %149, %cst_146 {dimension_numbers = #tpu.dot_dimension_numbers<[1], [0], [0], [1], [0, 0, 1, 1], [], []>} : vector<32x32xbf16>, vector<32x384xbf16>, vector<32x384xf32> -> vector<32x384xf32>
    %151 = arith.addf %144, %150 : vector<32x384xf32>
    %c3_147 = arith.constant 3 : index
    %c0_148 = arith.constant 0 : index
    %152 = vector.load %arg6[%c3_147, %c0_148] : memref<40x32xf32, #tpu.memory_space<vmem>>, vector<16x32xf32>
    %c23_149 = arith.constant 23 : index
    %c0_150 = arith.constant 0 : index
    %153 = vector.load %arg6[%c23_149, %c0_150] : memref<40x32xf32, #tpu.memory_space<vmem>>, vector<16x32xf32>
    %154 = tpu.concatenate %152, %153 in 0 : vector<16x32xf32>, vector<16x32xf32> -> vector<32x32xf32>
    %155 = arith.truncf %154 : vector<32x32xf32> to vector<32x32xbf16>
    %c96 = arith.constant 96 : index
    %c0_151 = arith.constant 0 : index
    %156 = vector.load %arg2[%c96, %c0_151] : memref<160x384xbf16, #tpu.memory_space<vmem>>, vector<32x384xbf16>
    %cst_152 = arith.constant dense<0.000000e+00> : vector<32x384xf32>
    %157 = tpu.matmul %155, %156, %cst_152 {dimension_numbers = #tpu.dot_dimension_numbers<[1], [0], [0], [1], [0, 0, 1, 1], [], []>} : vector<32x32xbf16>, vector<32x384xbf16>, vector<32x384xf32> -> vector<32x384xf32>
    %158 = arith.addf %151, %157 : vector<32x384xf32>
    %c4_153 = arith.constant 4 : index
    %c0_154 = arith.constant 0 : index
    %159 = vector.load %arg6[%c4_153, %c0_154] : memref<40x32xf32, #tpu.memory_space<vmem>>, vector<16x32xf32>
    %c24_155 = arith.constant 24 : index
    %c0_156 = arith.constant 0 : index
    %160 = vector.load %arg6[%c24_155, %c0_156] : memref<40x32xf32, #tpu.memory_space<vmem>>, vector<16x32xf32>
    %161 = tpu.concatenate %159, %160 in 0 : vector<16x32xf32>, vector<16x32xf32> -> vector<32x32xf32>
    %162 = arith.truncf %161 : vector<32x32xf32> to vector<32x32xbf16>
    %c128 = arith.constant 128 : index
    %c0_157 = arith.constant 0 : index
    %163 = vector.load %arg2[%c128, %c0_157] : memref<160x384xbf16, #tpu.memory_space<vmem>>, vector<32x384xbf16>
    %cst_158 = arith.constant dense<0.000000e+00> : vector<32x384xf32>
    %164 = tpu.matmul %162, %163, %cst_158 {dimension_numbers = #tpu.dot_dimension_numbers<[1], [0], [0], [1], [0, 0, 1, 1], [], []>} : vector<32x32xbf16>, vector<32x384xbf16>, vector<32x384xf32> -> vector<32x384xf32>
    %165 = arith.addf %158, %164 : vector<32x384xf32>
    %c0_159 = arith.constant 0 : index
    %c0_160 = arith.constant 0 : index
    %166 = vector.load %arg4[%c0_159, %c0_160] : memref<1x512xf32, #tpu.memory_space<vmem>>, vector<1x384xf32>
    %167 = vector.broadcast %166 : vector<1x384xf32> to vector<32x384xf32>
    %168 = arith.addf %165, %167 : vector<32x384xf32>
    %cst_161 = arith.constant 0.000000e+00 : f32
    %169 = vector.broadcast %cst_161 : f32 to vector<32x384xf32>
    %170 = arith.maximumf %168, %169 : vector<32x384xf32>
    %171 = vector.shape_cast %170 : vector<32x384xf32> to vector<2x16x384xf32>
    %cst_162 = arith.constant dense<0xFF800000> : vector<2x384xf32>
    %172 = vector.multi_reduction <maximumf>, %171, %cst_162 [1] : vector<2x16x384xf32> to vector<2x384xf32>
    %173 = arith.truncf %172 : vector<2x384xf32> to vector<2x384xbf16>
    %c0_163 = arith.constant 0 : index
    %c0_164 = arith.constant 0 : index
    %174 = vector.load %arg3[%c0_163, %c0_164] : memref<384x128xbf16, #tpu.memory_space<vmem>>, vector<384x128xbf16>
    %cst_165 = arith.constant dense<0.000000e+00> : vector<2x128xf32>
    %175 = tpu.matmul %173, %174, %cst_165 {dimension_numbers = #tpu.dot_dimension_numbers<[1], [0], [0], [1], [0, 0, 1, 1], [], []>} : vector<2x384xbf16>, vector<384x128xbf16>, vector<2x128xf32> -> vector<2x128xf32>
    %c0_166 = arith.constant 0 : index
    %c384 = arith.constant 384 : index
    %176 = vector.load %arg4[%c0_166, %c384] : memref<1x512xf32, #tpu.memory_space<vmem>>, vector<1x128xf32>
    %177 = vector.broadcast %176 : vector<1x128xf32> to vector<2x128xf32>
    %178 = arith.addf %175, %177 : vector<2x128xf32>
    %c0_167 = arith.constant 0 : index
    %c0_168 = arith.constant 0 : index
    %179 = vector.load %arg5[%c0_167, %c0_168] : memref<2x128xf32, #tpu.memory_space<vmem>>, vector<2x128xf32>
    tpu.vector_store %arg5[%c0_167, %c0_168], %178 {strides = array<i32>} : memref<2x128xf32, #tpu.memory_space<vmem>>, vector<2x128xf32>,
    return
  }
}

</mosaic_0001>

<bundles_post_ra>
// kernel: cnn_forward.1
= control target key start
LH: loop header
LB: loop body
LE: loop exit
PB: predicated region body
PF: predicated region fallthrough
CT: control target
= control target key end

     0   :  { %10 = vsyncpa [#allocation6], 0  ;;  %s2189_s0 = inlined_call_operand.vmem [shape: s32[2,16], index: 0, kind: input, shape index: {}]   ;;  %s2190_s1 = inlined_call_operand.vmem [shape: f32[50,32], index: 1, kind: input, shape index: {}]   ;;  %s2191_s2 = inlined_call_operand.hbm [shape: bf16[160,384], index: 2, kind: input, shape index: {}]   ;;  %s2192_s3 = inlined_call_operand.hbm [shape: bf16[384,128], index: 3, kind: input, shape index: {}]   ;;  %s2193_s4 = inlined_call_operand.vmem [shape: f32[1,512], index: 4, kind: input, shape index: {}]   ;;  %s2194_s5 = inlined_call_operand.hbm [shape: f32[2,128], index: 5, kind: output, shape index: {}]  }
   0x1   :  { %11 = vsyncpa [#allocation4], 0 }
   0x2   :  { %12 = vsyncpa [#allocation9], 0 }
   0x3   :  { %13 = vsyncpa [#allocation5], 0  ;;  %s20_s20 = sshll.u32 %s2189_s0, 4  ;;  %s21_s20 = int_to_ptr.vmem [resolvable:$true] %s20_s20 }
   0x4   :  { %s1784_s21 = scalar_lea.vmem %s21_s20, 32  ;;  %p1789_p1 = scmp.lt.s32.totalorder %s21_s20, %s21_s20 }
   0x5   :  { %p1785_p0 = scmp.ne.s32.totalorder %s21_s20, %s1784_s21  ;;  %p1790_p2 = scmp.lt.s32.totalorder %s1784_s21, %s1784_s21 }
   0x7   :  { %p1791_p3 = por %p1790_p2, %p1789_p1 }
   0x9   :  { %p1792_p4 = pnand %p1791_p3, %p1785_p0 }
   0xb   :  { %1795 = shalt.err (!%p1792_p4)
}
   0xc   :  { %s1870_s22 = smov [#allocation3]   ;;  %s1871_s23 = smov [#allocation7]  }
   0xd   :  { %23 = dma.vmem_to_smem %s21_s20, 32, %s1870_s22, [#allocation6]  }
   0xe   :  { %s31_s24 = sshll.u32 %s1871_s23, 4  ;;  %s1796_s27 = scalar_lea.hbm %s2191_s2, 3840  ;;  %s32_s24 = int_to_ptr.vmem [resolvable:$true] %s31_s24 }
   0xf   :  { %p1797_p5 = scmp.ne.s32.totalorder %s2191_s2, %s1796_s27  ;;  %p1800_p6 = scmp.lt.u32.totalorder %s1796_s27, %s2191_s2 }
  0x11   :  { %p1802_p7 = pnand %p1800_p6, %p1797_p5 }
  0x13   :  { %1805 = shalt.err (!%p1802_p7)
}
  0x14   :  { %s1806_s6 = scalar_lea.vmem %s32_s24, 3840  ;;  %p1811_p9 = scmp.lt.s32.totalorder %s32_s24, %s32_s24 }
  0x15   :  { %p1807_p8 = scmp.ne.s32.totalorder %s32_s24, %s1806_s6  ;;  %p1812_p10 = scmp.lt.s32.totalorder %s1806_s6, %s1806_s6 }
  0x17   :  { %p1813_p11 = por %p1812_p10, %p1811_p9 }
  0x19   :  { %p1814_p12 = pnand %p1813_p11, %p1807_p8 }
  0x1b   :  { %1817 = shalt.err (!%p1814_p12)
}
  0x1c   :  { %s1872_s7 = smov 192   ;;  %s1873_s8 = smov 12  }
  0x1d   :  { %37 = dma.hbm_to_vmem [thread:$0]  %s2191_s2, 3840, %s32_s24, [#allocation4], %s1872_s7, %s1872_s7, %s1873_s8  }
  0x1e   :  { %s1874_s11 = smov [#allocation8]   ;;  %s1818_s15 = scalar_lea.hbm %s2192_s3, 3072 }
  0x1f   :  { %s43_s12 = sshll.u32 %s1874_s11, 4  ;;  %p1819_p13 = scmp.ne.s32.totalorder %s2192_s3, %s1818_s15  ;;  %s44_s12 = int_to_ptr.vmem [resolvable:$true] %s43_s12 }
  0x20   :  { %p1822_p0 = scmp.lt.u32.totalorder %s1818_s15, %s2192_s3 }
  0x22   :  { %p1824_p1 = pnand %p1822_p0, %p1819_p13 }
  0x24   :  { %1827 = shalt.err (!%p1824_p1)
}
  0x25   :  { %s1828_s20 = scalar_lea.vmem %s44_s12, 3072  ;;  %p1833_p3 = scmp.lt.s32.totalorder %s44_s12, %s44_s12 }
  0x26   :  { %p1829_p2 = scmp.ne.s32.totalorder %s44_s12, %s1828_s20  ;;  %p1834_p4 = scmp.lt.s32.totalorder %s1828_s20, %s1828_s20 }
  0x28   :  { %p1835_p5 = por %p1834_p4, %p1833_p3 }
  0x2a   :  { %p1836_p6 = pnand %p1835_p5, %p1829_p2 }
  0x2c   :  { %1839 = shalt.err (!%p1836_p6)
}
  0x2d   :  { %s1875_s2 = smov 64   ;;  %s1876_s21 = smov 4  }
  0x2e   :  { %49 = dma.hbm_to_vmem [thread:$0]  %s2192_s3, 3072, %s44_s12, [#allocation9], %s1875_s2, %s1875_s2, %s1876_s21  }
  0x2f   :  { %1862 = dma.done.wait [#allocation6], 32  }
  0x30   :  { %1863 = vsyncadd [#allocation6], 4294967264 }
  0x31   :  { %1864 = dma.done.wait [#allocation4], 3840  }
  0x32   :  { %1865 = vsyncadd [#allocation4], 4294963456 }
  0x33   :  { %1866 = dma.done.wait [#allocation9], 3072  }
  0x34   :  { %1867 = vsyncadd [#allocation9], 4294964224 }
  0x35   :  { %61 = sfence }
  0x36   :  { %v1720_v0 = vld [vmem:[#allocation7 + $0x34] ss:$12 sps:$4 sm:$0xff]   ;;  %vm63_vm0 = vcmask 261120   ;;  %v1722_v1 = vld [vmem:[#allocation7 + $0x4] ss:$12 sps:$4 sm:$0xff]   ;;  %v1877_v2 = vmov 0  }
  0x37   :  { %296 = vmatprep.mubr.bf16.mxu1 %v1877_v2  ;;  %436 = vmatprep.mubr.bf16.mxu0 %v1877_v2  ;;  %v1724_v3 = vld [vmem:[#allocation7 + $0x30] ss:$12 sps:$4 sm:$0xff]   ;;  %v1725_v4 = vld [vmem:[#allocation7] ss:$12 sps:$4 sm:$0xff]   ;;  %v1878_v5 = vmov 0.0   ;;  %s69_s3 = sld [smem:[#allocation3]] }
  0x38   :  { %264 = vmatprep.subr.bf16.mxu1 %v1720_v0  ;;  %64 = vst.msk [vmem:[#allocation2] sm:$0xff] %vm63_vm0, %v1878_v5  ;;  %65 = vst.msk [vmem:[#allocation2 + $0x8] sm:$0xff] %vm63_vm0, %v1878_v5  ;;  %404 = vmatprep.subr.bf16.mxu0 %v1722_v1  ;;  %v1726_v6 = vld [vmem:[#allocation7 + $0x4c] ss:$12 sps:$4 sm:$0xff]   ;;  %v1728_v7 = vld [vmem:[#allocation7 + $0x1c] ss:$12 sps:$4 sm:$0xff]  }
  0x39   :  { %66 = vst.msk [vmem:[#allocation2 + $0x10] sm:$0xff] %vm63_vm0, %v1878_v5  ;;  %67 = vst.msk [vmem:[#allocation2 + $0x18] sm:$0xff] %vm63_vm0, %v1878_v5  ;;  %265 = vmatpush1.bf16.msra.mxu1 %v1724_v3  ;;  %405 = vmatpush1.bf16.msra.mxu0 %v1725_v4  ;;  %v1730_v8 = vld [vmem:[#allocation7 + $0x48] ss:$12 sps:$4 sm:$0xff]   ;;  %v1731_v9 = vld [vmem:[#allocation7 + $0x18] ss:$12 sps:$4 sm:$0xff]  }
  0x3a   :  { %68 = vst.msk [vmem:[#allocation2 + $0x20] sm:$0xff] %vm63_vm0, %v1878_v5  ;;  %266 = vmatprep.subr.bf16.mxu1 %v1726_v6  ;;  %406 = vmatprep.subr.bf16.mxu0 %v1728_v7  ;;  %v1950_v10 = vld [vmem:[#allocation7 + $0x38] ss:$12 sps:$4 sm:$0xff]   ;;  %s1444_s24 = sld [smem:[#allocation3 + $0x1]]  ;;  %vm72_vm1 = vcmask 253952   ;;  %s1445_s25 = sld [smem:[#allocation3 + $0x2]] }
  0x3b   :  { %v1735_v11 = vld [vmem:[#allocation7 + $0x64] ss:$12 sps:$4 sm:$0xff]   ;;  %s1446_s26 = sld [smem:[#allocation3 + $0x3]]  ;;  %s1447_s27 = sld [smem:[#allocation3 + $0x4]]  ;;  %v1733_v38 = vld [vmem:[#allocation7 + $0x60] ss:$12 sps:$4 sm:$0xff]  }
  0x3c   :  { %s1448_s30 = sld [smem:[#allocation3 + $0x5]]  ;;  %s1449_s6 = sld [smem:[#allocation3 + $0x6]]  ;;  %v1736_v44 = vld [vmem:[#allocation7 + $0x50] ss:$12 sps:$4 sm:$0xff]   ;;  %v1737_v46 = vld [vmem:[#allocation7 + $0x78] ss:$12 sps:$4 sm:$0xff]  }
  0x3d   :  { %267 = vmatpush1.bf16.msra.mxu1 %v1730_v8  ;;  %407 = vmatpush1.bf16.msra.mxu0 %v1731_v9  ;;  %s70_s0 = scalar_lea.vmem %s2190_s1, %s69_s3  ;;  %s1450_s7 = sld [smem:[#allocation3 + $0x7]]  ;;  %v1739_v45 = vld [vmem:[#allocation7 + $0x7c] ss:$12 sps:$4 sm:$0xff]   ;;  %v1743_v49 = vld [vmem:[#allocation7 + $0x94] ss:$12 sps:$4 sm:$0xff]   ;;  %vm1879_vm2 = vmmov 0  }
  0x3e   :  { %1601 = vmatprep.subr.bf16.mxu1 %v1950_v10  ;;  %558 = vmatprep.subr.bf16.mxu0 %v1735_v11  ;;  %v71_v12 = vld [vmem:[%s70_s0] sm:$0x1]  ;;  %s1451_s8 = sld [smem:[#allocation3 + $0x8]]  ;;  %s1452_s9 = sld [smem:[#allocation3 + $0x9]]  ;;  %v1740_v52 = vld [vmem:[#allocation7 + $0x8] ss:$12 sps:$4 sm:$0xff]  }
  0x3f   :  { %73 = vst.msk [vmem:[#allocation2 + $0x2] sm:$0x1] %vm72_vm1, %v71_v12  ;;  %s1960_s13 = sld [smem:[#allocation3 + $0xa]]  ;;  %s1965_s17 = sld [smem:[#allocation3 + $0xb]]  ;;  %v1741_v0 = vld [vmem:[#allocation7 + $0x90] ss:$12 sps:$4 sm:$0xff]  }
  0x40   :  { %s75_s12 = scalar_lea.vmem %s2190_s1, %s1444_s24  ;;  %s79_s16 = scalar_lea.vmem %s2190_s1, %s1445_s25  ;;  %v1744_v3 = vld [vmem:[#allocation7 + $0x20] ss:$12 sps:$4 sm:$0xff]   ;;  %v1745_v6 = vld [vmem:[#allocation7 + $0xa8] ss:$12 sps:$4 sm:$0xff]   ;;  %v1751_v9 = vld [vmem:[#allocation7 + $0xc4] ss:$12 sps:$4 sm:$0xff]  }
  0x41   :  { %v76_v13 = vld [vmem:[%s75_s12] sm:$0x1]  ;;  %s83_s20 = scalar_lea.vmem %s2190_s1, %s1446_s26  ;;  %s87_s22 = scalar_lea.vmem %s2190_s1, %s1447_s27  ;;  %vm1160_vm3 = vcmask 1041409  }
  0x42   :  { %77 = vst.msk [vmem:[#allocation2 + $0x3] sm:$0x1] %vm72_vm1, %v76_v13  ;;  %v80_v14 = vld [vmem:[%s79_s16] sm:$0x1]  ;;  %s91_s24 = scalar_lea.vmem %s2190_s1, %s1448_s30  ;;  %s1978_s25 = sld [smem:[#allocation3 + $0xc]] }
  0x43   :  { %81 = vst.msk [vmem:[#allocation2 + $0x4] sm:$0x1] %vm72_vm1, %v80_v14  ;;  %v84_v15 = vld [vmem:[%s83_s20] sm:$0x1]  ;;  %s95_s27 = scalar_lea.vmem %s2190_s1, %s1449_s6  ;;  %s99_s10 = scalar_lea.vmem %s2190_s1, %s1450_s7  ;;  %v1752_v14 = vld [vmem:[#allocation7 + $0x80] ss:$12 sps:$4 sm:$0xff]  }
  0x44   :  { %v88_v16 = vld [vmem:[%s87_s22] sm:$0x1]  ;;  %85 = vst.msk [vmem:[#allocation2 + $0x5] sm:$0x1] %vm72_vm1, %v84_v15  ;;  %s103_s12 = scalar_lea.vmem %s2190_s1, %s1451_s8  ;;  %s107_s16 = scalar_lea.vmem %s2190_s1, %s1452_s9 }
  0x45   :  { %89 = vst.msk [vmem:[#allocation2 + $0x6] sm:$0x1] %vm72_vm1, %v88_v16  ;;  %v92_v17 = vld [vmem:[%s91_s24] sm:$0x1]  ;;  %s111_s18 = scalar_lea.vmem %s2190_s1, %s1960_s13  ;;  %s1456_s19 = sld [smem:[#allocation3 + $0xd]] }
  0x46   :  { %93 = vst.msk [vmem:[#allocation2 + $0x7] sm:$0x1] %vm72_vm1, %v92_v17  ;;  %v96_v18 = vld [vmem:[%s95_s27] sm:$0x1]  ;;  %s115_s9 = scalar_lea.vmem %s2190_s1, %s1965_s17  ;;  %s1457_s2 = sld [smem:[#allocation3 + $0xe]] }
  0x47   :  { %v100_v19 = vld [vmem:[%s99_s10] sm:$0x1]  ;;  %97 = vst.msk [vmem:[#allocation2 + $0x8] sm:$0x1] %vm72_vm1, %v96_v18  ;;  %s1459_s21 = sld [smem:[#allocation3 + $0x80]]  ;;  %s1460_s22 = sld [smem:[#allocation3 + $0x81]] }
  0x48   :  { %101 = vst.msk [vmem:[#allocation2 + $0x9] sm:$0x1] %vm72_vm1, %v100_v19  ;;  %v104_v20 = vld [vmem:[%s103_s12] sm:$0x1]  ;;  %s119_s3 = scalar_lea.vmem %s2190_s1, %s1978_s25  ;;  %s1461_s24 = sld [smem:[#allocation3 + $0x82]] }
  0x49   :  { %v108_v21 = vld [vmem:[%s107_s16] sm:$0x1]  ;;  %105 = vst.msk [vmem:[#allocation2 + $0xa] sm:$0x1] %vm72_vm1, %v104_v20  ;;  %s1462_s26 = sld [smem:[#allocation3 + $0x83]]  ;;  %s1463_s28 = sld [smem:[#allocation3 + $0x84]] }
  0x4a   :  { %109 = vst.msk [vmem:[#allocation2 + $0xb] sm:$0x1] %vm72_vm1, %v108_v21  ;;  %v112_v22 = vld [vmem:[%s111_s18] sm:$0x1]  ;;  %s2014_s27 = sld [smem:[#allocation3 + $0x85]]  ;;  %s2016_s17 = sld [smem:[#allocation3 + $0x86]] }
  0x4b   :  { %113 = vst.msk [vmem:[#allocation2 + $0xc] sm:$0x1] %vm72_vm1, %v112_v22  ;;  %v116_v23 = vld [vmem:[%s115_s9] sm:$0x1]  ;;  %s123_s10 = scalar_lea.vmem %s2190_s1, %s1456_s19  ;;  %s2021_s30 = sld [smem:[#allocation3 + $0x87]] }
  0x4c   :  { %117 = vst.msk [vmem:[#allocation2 + $0xd] sm:$0x1] %vm72_vm1, %v116_v23  ;;  %v120_v24 = vld [vmem:[%s119_s3] sm:$0x1]  ;;  %s127_s25 = scalar_lea.vmem %s2190_s1, %s1457_s2  ;;  %s2026_s14 = sld [smem:[#allocation3 + $0x88]] }
  0x4d   :  { %121 = vst.msk [vmem:[#allocation2 + $0xe] sm:$0x1] %vm72_vm1, %v120_v24  ;;  %v124_v25 = vld [vmem:[%s123_s10] sm:$0x1]  ;;  %s135_s6 = scalar_lea.vmem %s2190_s1, %s1459_s21  ;;  %s139_s19 = scalar_lea.vmem %s2190_s1, %s1460_s22  ;;  %v1749_v16 = vld [vmem:[#allocation7 + $0xc0] ss:$12 sps:$4 sm:$0xff]  }
  0x4e   :  { %125 = vst.msk [vmem:[#allocation2 + $0xf] sm:$0x1] %vm72_vm1, %v124_v25  ;;  %v128_v26 = vld [vmem:[%s127_s25] sm:$0x1]  ;;  %s143_s9 = scalar_lea.vmem %s2190_s1, %s1461_s24  ;;  %s2039_s2 = sld [smem:[#allocation3 + $0x89]]  ;;  %v212_v33 = vld [vmem:[#allocation2 + $0x1] sm:$0xff] }
  0x4f   :  { %129 = vst.msk [vmem:[#allocation2 + $0x10] sm:$0x1] %vm72_vm1, %v128_v26  ;;  %v136_v27 = vld [vmem:[%s135_s6] sm:$0x1]  ;;  %s147_s22 = scalar_lea.vmem %s2190_s1, %s1462_s26  ;;  %s151_s29 = scalar_lea.vmem %s2190_s1, %s1463_s28  ;;  %v506_v62 = vld [vmem:[#allocation2 + $0x2] sm:$0xff] }
  0x50   :  { %v140_v28 = vld [vmem:[%s139_s19] sm:$0x1]  ;;  %137 = vst.msk [vmem:[#allocation2 + $0x16] sm:$0x1] %vm72_vm1, %v136_v27  ;;  %s155_s10 = scalar_lea.vmem %s2190_s1, %s2014_s27  ;;  %s159_s25 = scalar_lea.vmem %s2190_s1, %s2016_s17  ;;  %v672_v12 = vld [vmem:[#allocation2 + $0x3] sm:$0xff] }
  0x51   :  { %141 = vst.msk [vmem:[#allocation2 + $0x17] sm:$0x1] %vm72_vm1, %v140_v28  ;;  %v144_v29 = vld [vmem:[%s143_s9] sm:$0x1]  ;;  %s163_s15 = scalar_lea.vmem %s2190_s1, %s2021_s30  ;;  %s2064_s16 = sld [smem:[#allocation3 + $0x8a]]  ;;  %v838_v24 = vld [vmem:[#allocation2 + $0x4] sm:$0xff] }
  0x52   :  { %v198_v30 = vld [vmem:[#allocation2] sm:$0xff]  ;;  %145 = vst.msk [vmem:[#allocation2 + $0x18] sm:$0x1] %vm72_vm1, %v144_v29  ;;  %s167_s6 = scalar_lea.vmem %s2190_s1, %s2026_s14  ;;  %s2072_s7 = sld [smem:[#allocation3 + $0x8b]]  ;;  %v1758_v26 = vld [vmem:[#allocation7 + $0xc8] ss:$12 sps:$4 sm:$0xff]  }
  0x53   :  { %v148_v31 = vld [vmem:[%s147_s22] sm:$0x1]  ;;  %s2075_s18 = sld [smem:[#allocation3 + $0x8c]]  ;;  %s2077_s19 = sld [smem:[#allocation3 + $0x8d]]  ;;  %v1756_v17 = vld [vmem:[#allocation7 + $0xdc] ss:$12 sps:$4 sm:$0xff]  }
  0x54   :  { %v152_v32 = vld [vmem:[%s151_s29] sm:$0x1]  ;;  %149 = vst.msk [vmem:[#allocation2 + $0x19] sm:$0x1] %vm72_vm1, %v148_v31  ;;  %s171_s20 = scalar_lea.vmem %s2190_s1, %s2039_s2  ;;  %s2084_s9 = sld [smem:[#allocation3 + $0x8e]] }
  0x55   :  { %153 = vst.msk [vmem:[#allocation2 + $0x1a] sm:$0x1] %vm72_vm1, %v152_v32  ;;  %v156_v34 = vld [vmem:[%s155_s10] sm:$0x1]  ;;  %v199_v39 = vld [vmem:[#allocation2 + $0x8] sm:$0xff]  ;;  %s2088_s14 = sld [smem:[#allocation3 + $0xf]] }
  0x56   :  { %v160_v35 = vld [vmem:[%s159_s25] sm:$0x1]  ;;  %157 = vst.msk [vmem:[#allocation2 + $0x1b] sm:$0x1] %vm72_vm1, %v156_v34  ;;  %v213_v40 = vld [vmem:[#allocation2 + $0x9] sm:$0xff]  ;;  %v2086_v41 = vpack.c.bf16 %v199_v39, %v198_v30  ;;  %s2091_s21 = sld [smem:[#allocation3 + $0x8f]] }
  0x57   :  { %161 = vst.msk [vmem:[#allocation2 + $0x1c] sm:$0x1] %vm72_vm1, %v160_v35  ;;  %v164_v36 = vld [vmem:[%s163_s15] sm:$0x1]  ;;  %v216_v43 = vpack.c.bf16 %v213_v40, %v212_v33  ;;  %s175_s22 = scalar_lea.vmem %s2190_s1, %s2064_s16  ;;  %v1757_v23 = vld [vmem:[#allocation7 + $0xb0] ss:$12 sps:$4 sm:$0xff]  }
  0x58   :  { %165 = vst.msk [vmem:[#allocation2 + $0x1d] sm:$0x1] %vm72_vm1, %v164_v36  ;;  %v168_v37 = vld [vmem:[%s167_s6] sm:$0x1]  ;;  %1491 = vmatmul.mubr.msk.bf16.vlgmr.msra.gmra.mrb[0].mxu0 %vm63_vm0, %v2086_v41  ;;  %s179_s29 = scalar_lea.vmem %s2190_s1, %s2072_s7  ;;  %v1759_v30 = vld [vmem:[#allocation7 + $0xe0] ss:$12 sps:$4 sm:$0xff]  }
  0x59   :  { %169 = vst.msk [vmem:[#allocation2 + $0x1e] sm:$0x1] %vm72_vm1, %v168_v37  ;;  %v172_v42 = vld [vmem:[%s171_s20] sm:$0x1]  ;;  %1481 = vmatmul.mubr.msk.bf16.vlgmr.msra.gmra.mrb[0].mxu1 %vm63_vm0, %v216_v43  ;;  %559 = vmatpush1.bf16.msra.mxu0 %v1733_v38  ;;  %s183_s10 = scalar_lea.vmem %s2190_s1, %s2075_s18  ;;  %s187_s25 = scalar_lea.vmem %s2190_s1, %s2077_s19  ;;  %v1760_v32 = vld [vmem:[#allocation8 + $0x40] sm:$0xff]   ;;  %v1765_v36 = vld [vmem:[#allocation8 + $0x50] sm:$0xff]  }
  0x5a   :  { %173 = vst.msk [vmem:[#allocation2 + $0x1f] sm:$0x1] %vm72_vm1, %v172_v42  ;;  %v176_v47 = vld [vmem:[%s175_s22] sm:$0x1]  ;;  %1602 = vmatpush3.bf16.msra.mxu1 %v1950_v10  ;;  %306 = vmatprep.mubr.bf16.mxu1 %v1877_v2  ;;  %s191_s15 = scalar_lea.vmem %s2190_s1, %s2084_s9  ;;  %v1748_v10 = vld [vmem:[#allocation7 + $0x68] ss:$12 sps:$4 sm:$0xff]  }
  0x5b   :  { %177 = vst.msk [vmem:[#allocation2 + $0x20] sm:$0x1] %vm72_vm1, %v176_v47  ;;  %v180_v48 = vld [vmem:[%s179_s29] sm:$0x1]  ;;  %1603 = vmatprep.subr.bf16.mxu1 %v1736_v44  ;;  %446 = vmatprep.mubr.bf16.mxu0 %v1877_v2  ;;  %s131_s17 = scalar_lea.vmem %s2190_s1, %s2088_s14  ;;  %v1761_v33 = vld [vmem:[#allocation8] sm:$0xff]   ;;  %v1766_v37 = vld [vmem:[#allocation8 + $0x10] sm:$0xff]  }
  0x5c   :  { %181 = vst.msk [vmem:[#allocation2 + $0x21] sm:$0x1] %vm72_vm1, %v180_v48  ;;  %v184_v50 = vld [vmem:[%s183_s10] sm:$0x1]  ;;  %560 = vmatprep.subr.bf16.mxu0 %v1739_v45  ;;  %s195_s18 = scalar_lea.vmem %s2190_s1, %s2091_s21  ;;  %v1764_v35 = vld [vmem:[#allocation8 + $0x80] sm:$0xff]   ;;  %v1768_v39 = vld [vmem:[#allocation8 + $0x58] sm:$0xff]  }
  0x5d   :  { %v188_v51 = vld [vmem:[%s187_s25] sm:$0x1]  ;;  %185 = vst.msk [vmem:[#allocation2 + $0x22] sm:$0x1] %vm72_vm1, %v184_v50  ;;  %561 = vmatpush1.bf16.msra.mxu0 %v1737_v46  ;;  %v200_v57 = vld [vmem:[#allocation2 + $0x14] sm:$0xff]  ;;  %v1777_v48 = vld [vmem:[#allocation8 + $0x70] sm:$0xff]  }
  0x5e   :  { %189 = vst.msk [vmem:[#allocation2 + $0x23] sm:$0x1] %vm72_vm1, %v188_v51  ;;  %v192_v53 = vld [vmem:[%s191_s15] sm:$0x1]  ;;  %1604 = vmatpush3.bf16.msra.mxu1 %v1736_v44  ;;  %724 = vmatprep.subr.bf16.mxu0 %v1743_v49  ;;  %v214_v56 = vld [vmem:[#allocation2 + $0x15] sm:$0xff]  ;;  %v1778_v49 = vld [vmem:[#allocation8 + $0x30] sm:$0xff]  }
  0x5f   :  { %193 = vst.msk [vmem:[#allocation2 + $0x24] sm:$0x1] %vm72_vm1, %v192_v53  ;;  %v132_v54 = vld [vmem:[%s131_s17] sm:$0x1]  ;;  %1609 = vmatprep.subr.bf16.mxu1 %v1740_v52  ;;  %v508_v7 = vld [vmem:[#allocation2 + $0x16] sm:$0xff]  ;;  %v1782_v53 = vld [vmem:[#allocation8 + $0xb0] sm:$0xff]  }
  0x60   :  { %133 = vst.msk [vmem:[#allocation2 + $0x11] sm:$0x1] %vm72_vm1, %v132_v54  ;;  %v196_v55 = vld [vmem:[%s195_s18] sm:$0x1]  ;;  %v674_v20 = vld [vmem:[#allocation2 + $0x17] sm:$0xff]  ;;  %s1880_s20 = smov [#allocation10]  }
  0x61   :  { %197 = vst.msk [vmem:[#allocation2 + $0x25] sm:$0x1] %vm72_vm1, %v196_v55  ;;  %v1747_v4 = vld [vmem:[#allocation7 + $0xac] ss:$12 sps:$4 sm:$0xff]   ;;  %v840_v28 = vld [vmem:[#allocation2 + $0x18] sm:$0xff]  ;;  %s1401_s9 = sshll.u32 %s1880_s20, 4  ;;  %s1402_s9 = int_to_ptr.vmem [resolvable:$true] %s1401_s9 }
  0x62   :  { %v1753_v18 = vld [vmem:[#allocation7 + $0x98] ss:$12 sps:$4 sm:$0xff]   ;;  %v1769_v40 = vld [vmem:[#allocation8 + $0x18] sm:$0xff]   ;;  %v1771_v42 = vld [vmem:[#allocation8 + $0x60] sm:$0xff]   ;;  %s1840_s14 = scalar_lea.vmem %s1402_s9, 32  ;;  %p1845_p8 = scmp.lt.s32.totalorder %s1402_s9, %s1402_s9 }
  0x63   :  { %v1754_v19 = vld [vmem:[#allocation7 + $0xd8] ss:$12 sps:$4 sm:$0xff]   ;;  %v1773_v44 = vld [vmem:[#allocation8 + $0x98] sm:$0xff]   ;;  %v1776_v47 = vld [vmem:[#allocation8 + $0xa0] sm:$0xff]   ;;  %p1841_p7 = scmp.ne.s32.totalorder %s1402_s9, %s1840_s14  ;;  %p1846_p9 = scmp.lt.s32.totalorder %s1840_s14, %s1840_s14 }
  0x64   :  { %v1763_v34 = vld [vmem:[#allocation8 + $0x8] sm:$0xff]   ;;  %v1780_v51 = vld [vmem:[#allocation8 + $0x78] sm:$0xff]  }
  0x65   :  { %v201_v58 = vld [vmem:[#allocation2 + $0x1c] sm:$0xff]  ;;  %v1783_v54 = vld [vmem:[#allocation8 + $0xb8] sm:$0xff]   ;;  %p1847_p10 = por %p1846_p9, %p1845_p8 }
  0x66   :  { %v215_v59 = vld [vmem:[#allocation2 + $0x1d] sm:$0xff]  ;;  %v203_v60 = vpack.c.bf16 %v201_v58, %v200_v57 }
  0x67   :  { %v217_v61 = vpack.c.bf16 %v215_v59, %v214_v56  ;;  %v507_v63 = vld [vmem:[#allocation2 + $0xa] sm:$0xff]  ;;  %v1767_v38 = vld [vmem:[#allocation8 + $0x88] sm:$0xff]   ;;  %p1848_p11 = pnand %p1847_p10, %p1841_p7 }
  0x68   :  { %1492 = vmatmul.mubr.msk.bf16.gmra.mrb[4].mxu0 %vm63_vm0, %v203_v60  ;;  %v510_v1 = vpack.c.bf16 %v507_v63, %v506_v62  ;;  %v509_v8 = vld [vmem:[#allocation2 + $0x1e] sm:$0xff]  ;;  %v673_v13 = vld [vmem:[#allocation2 + $0xb] sm:$0xff]  ;;  %v1006_v63 = vlaneseq }
  0x69   :  { %1482 = vmatmul.mubr.msk.bf16.gmra.mrb[4].mxu1 %vm63_vm0, %v217_v61  ;;  %590 = vmatprep.mubr.bf16.mxu0 %v1877_v2  ;;  %v511_v11 = vpack.c.bf16 %v509_v8, %v508_v7  ;;  %v676_v15 = vpack.c.bf16 %v673_v13, %v672_v12  ;;  %v675_v21 = vld [vmem:[#allocation2 + $0x1f] sm:$0xff]  ;;  %v839_v25 = vld [vmem:[#allocation2 + $0xc] sm:$0xff] }
  0x6a   :  { %1605 = vmatprep.mubr.msk.bf16.mxu1 %vm63_vm0, %v216_v43  ;;  %v677_v22 = vpack.c.bf16 %v675_v21, %v674_v20  ;;  %v842_v27 = vpack.c.bf16 %v839_v25, %v838_v24  ;;  %v841_v29 = vld [vmem:[#allocation2 + $0x20] sm:$0xff]  ;;  %v1772_v43 = vld [vmem:[#allocation8 + $0x20] sm:$0xff]  }
  0x6b   :  { %v843_v31 = vpack.c.bf16 %v841_v29, %v840_v28  ;;  %v1774_v45 = vld [vmem:[#allocation8 + $0x68] sm:$0xff]  }
  0x6c   :  { %v1775_v46 = vld [vmem:[#allocation8 + $0x28] sm:$0xff]  }
  0x6d   :  { %v1779_v50 = vld [vmem:[#allocation8 + $0xa8] sm:$0xff]  }
  0x70   :  { %1501 = vmatmul.mubr.msk.bf16.vlgmr.msra.gmra.mrb[0].mxu0 %vm63_vm0, %v510_v1 }
  0x71   :  { %1606 = vmatmul.mubr.msk.bf16.vlgmr.msra.gmra.mrb[8].mxu1 %vm63_vm0, %v217_v61  ;;  %725 = vmatpush1.bf16.msra.mxu0 %v1741_v0  ;;  %v1007_v0 = vshrl.u32 %v1006_v63, 7 }
  0x72   :  { %1610 = vmatpush3.bf16.msra.mxu1 %v1740_v52  ;;  %600 = vmatprep.mubr.bf16.mxu0 %v1877_v2  ;;  %v1781_v52 = vld [vmem:[#allocation8 + $0x38] sm:$0xff]  }
  0x73   :  { %1611 = vmatprep.subr.bf16.mxu1 %v1744_v3  ;;  %726 = vmatprep.subr.bf16.mxu0 %v1747_v4  ;;  %v1012_v4 = vsub.s32 1, %v1007_v0 }
  0x74   :  { %1613 = vmatprep.mubr.msk.bf16.mxu1 %vm63_vm0, %v2086_v41  ;;  %v1770_v41 = vld [vmem:[#allocation8 + $0x90] sm:$0xff]  }
  0x75   :  { %727 = vmatpush1.bf16.msra.mxu0 %v1745_v6 }
  0x76   :  { %1612 = vmatpush3.bf16.msra.mxu1 %v1744_v3  ;;  %890 = vmatprep.subr.bf16.mxu0 %v1751_v9  ;;  %v1004_v3 = vld [vmem:[%s2193_s4] sm:$0x7] }
  0x77   :  { %1617 = vmatprep.subr.bf16.mxu1 %v1748_v10  ;;  %v1013_v8 = vrot.slane %v1004_v3, %v1012_v4 }
  0x78   :  { %1502 = vmatmul.mubr.msk.bf16.gmra.mrb[4].mxu0 %vm63_vm0, %v511_v11 }
  0x79   :  { %756 = vmatprep.mubr.bf16.mxu0 %v1877_v2 }
  0x7d   :  { %1614 = vmatmul.mubr.msk.bf16.vlgmr.msra.gmra.mrb[8].mxu1 %vm63_vm0, %v203_v60 }
  0x7e   :  { %1618 = vmatpush3.bf16.msra.mxu1 %v1748_v10  ;;  %1621 = vmatprep.mubr.msk.bf16.mxu1 %vm63_vm0, %v510_v1  ;;  %v1008_v1 = vsub.s32 0, %v1007_v0 }
  0x7f   :  { %1619 = vmatprep.subr.bf16.mxu1 %v1752_v14 }
  0x80   :  { %1511 = vmatmul.mubr.msk.bf16.vlgmr.msra.gmra.mrb[0].mxu0 %vm63_vm0, %v676_v15  ;;  %v1009_v6 = vrot.slane %v1004_v3, %v1008_v1 }
  0x81   :  { %891 = vmatpush1.bf16.msra.mxu0 %v1749_v16  ;;  %766 = vmatprep.mubr.bf16.mxu0 %v1877_v2 }
  0x82   :  { %1620 = vmatpush3.bf16.msra.mxu1 %v1752_v14  ;;  %892 = vmatprep.subr.bf16.mxu0 %v1756_v17 }
  0x83   :  { %1625 = vmatprep.subr.bf16.mxu1 %v1753_v18 }
  0x85   :  { %893 = vmatpush1.bf16.msra.mxu0 %v1754_v19 }
  0x86   :  { %1641 = vmatprep.subr.bf16.mxu0 %v1878_v5 }
  0x88   :  { %1512 = vmatmul.mubr.msk.bf16.gmra.mrb[4].mxu0 %vm63_vm0, %v677_v22 }
  0x89   :  { %1622 = vmatmul.mubr.msk.bf16.vlgmr.msra.gmra.mrb[8].mxu1 %vm63_vm0, %v511_v11  ;;  %922 = vmatprep.mubr.bf16.mxu0 %v1877_v2 }
  0x8a   :  { %1626 = vmatpush3.bf16.msra.mxu1 %v1753_v18  ;;  %1629 = vmatprep.mubr.msk.bf16.mxu1 %vm63_vm0, %v676_v15 }
  0x8b   :  { %1627 = vmatprep.subr.bf16.mxu1 %v1757_v23 }
  0x8e   :  { %1628 = vmatpush3.bf16.msra.mxu1 %v1757_v23 }
  0x8f   :  { %1633 = vmatprep.subr.bf16.mxu1 %v1758_v26 }
  0x90   :  { %1521 = vmatmul.mubr.msk.bf16.vlgmr.msra.gmra.mrb[0].mxu0 %vm63_vm0, %v842_v27 }
  0x91   :  { %932 = vmatprep.mubr.bf16.mxu0 %v1877_v2  ;;  %v1762_v2 = vld [vmem:[#allocation8 + $0x48] sm:$0xff]   ;;  %1642 = vmatpush3.bf16.msra.mxu0 %v1764_v35 }
  0x92   :  { %1643 = vmatprep.subr.bf16.mxu0 %v1878_v5 }
  0x95   :  { %1630 = vmatmul.mubr.msk.bf16.vlgmr.msra.gmra.mrb[8].mxu1 %vm63_vm0, %v677_v22  ;;  %1644 = vmatpush3.bf16.msra.mxu0 %v1767_v38 }
  0x96   :  { %1634 = vmatpush3.bf16.msra.mxu1 %v1758_v26  ;;  %1637 = vmatprep.mubr.msk.bf16.mxu1 %vm63_vm0, %v842_v27 }
  0x97   :  { %1635 = vmatprep.subr.bf16.mxu1 %v1759_v30  ;;  %1645 = vmatprep.subr.bf16.mxu0 %v1878_v5 }
  0x98   :  { %1522 = vmatmul.mubr.msk.bf16.gmra.mrb[4].mxu0 %vm63_vm0, %v843_v31 }
  0x99   :  { %1646 = vmatpush3.bf16.msra.mxu0 %v1770_v41  ;;  %1657 = vmatprep.mubr.msk.bf16.mxu0 %vm1879_vm2, %v1878_v5 }
  0x9a   :  { %1636 = vmatpush3.bf16.msra.mxu1 %v1759_v30  ;;  %1647 = vmatprep.subr.bf16.mxu0 %v1878_v5  ;;  %v1016_v30 = vsub.s32 2, %v1007_v0 }
  0x9b   :  { %1570 = vmatprep.subr.bf16.mxu1 %v1760_v32 }
  0x9c   :  { %v1017_v41 = vrot.slane %v1004_v3, %v1016_v30 }
  0x9d   :  { %1648 = vmatpush3.bf16.msra.mxu0 %v1773_v44 }
  0x9e   :  { %1649 = vmatprep.subr.bf16.mxu0 %v1878_v5 }
  0xa1   :  { %1638 = vmatmul.mubr.msk.bf16.vlgmr.msra.gmra.mrb[8].mxu1 %vm63_vm0, %v843_v31  ;;  %1650 = vmatpush3.bf16.msra.mxu0 %v1776_v47 }
  0xa2   :  { %1571 = vmatpush3.bf16.msra.mxu1 %v1761_v33  ;;  %1651 = vmatprep.subr.bf16.mxu0 %v1878_v5 }
  0xa3   :  { %1572 = vmatprep.subr.bf16.mxu1 %v1762_v2 }
  0xa5   :  { %1652 = vmatpush3.bf16.msra.mxu0 %v1779_v50 }
  0xa6   :  { %1573 = vmatpush3.bf16.msra.mxu1 %v1763_v34  ;;  %1653 = vmatprep.subr.bf16.mxu0 %v1878_v5 }
  0xa7   :  { %1574 = vmatprep.subr.bf16.mxu1 %v1765_v36 }
  0xa9   :  { %1654 = vmatpush3.bf16.msra.mxu0 %v1782_v53 }
  0xaa   :  { %1575 = vmatpush3.bf16.msra.mxu1 %v1766_v37  ;;  %1655 = vmatprep.subr.bf16.mxu0 %v1878_v5 }
  0xab   :  { %1576 = vmatprep.subr.bf16.mxu1 %v1768_v39 }
  0xad   :  { %1656 = vmatpush3.bf16.msra.mxu0 %v1783_v54 }
  0xae   :  { %1577 = vmatpush3.bf16.msra.mxu1 %v1769_v40 }
  0xaf   :  { %1578 = vmatprep.subr.bf16.mxu1 %v1771_v42 }
  0xb2   :  { %1579 = vmatpush3.bf16.msra.mxu1 %v1772_v43 }
  0xb3   :  { %1580 = vmatprep.subr.bf16.mxu1 %v1774_v45 }
  0xb6   :  { %1581 = vmatpush3.bf16.msra.mxu1 %v1775_v46 }
  0xb7   :  { %1582 = vmatprep.subr.bf16.mxu1 %v1777_v48 }
  0xba   :  { %1583 = vmatpush3.bf16.msra.mxu1 %v1778_v49 }
  0xbb   :  { %1584 = vmatprep.subr.bf16.mxu1 %v1780_v51 }
  0xbe   :  { %1585 = vmatpush3.bf16.msra.mxu1 %v1781_v52 }
 0x12c   :  { %v298_v55 = vpop.f32.mrb[0].mxu1 }
 0x12d   :  { %v300_v56 = vpop.f32.mrb[1].mxu1 }
 0x12e   :  { %v302_v57 = vpop.f32.mrb[2].mxu1 }
 0x12f   :  { %v304_v58 = vpop.f32.mrb[3].mxu1 }
 0x13c   :  { %v308_v59 = vpop.f32.mrb[4].mxu1 }
 0x13d   :  { %v310_v60 = vpop.f32.mrb[5].mxu1 }
 0x13e   :  { %v312_v61 = vpop.f32.mrb[6].mxu1 }
 0x13f   :  { %v314_v62 = vpop.f32.mrb[7].mxu1 }
 0x163   :  { %v924_v7 = vpop.f32.mrb[0].mxu0 }
 0x164   :  { %v1661_v5 = vadd.f32 %v924_v7, %v298_v55  ;;  %v926_v9 = vpop.f32.mrb[1].mxu0 }
 0x165   :  { %v1662_v10 = vadd.f32 %v926_v9, %v300_v56  ;;  %v928_v11 = vpop.f32.mrb[2].mxu0 }
 0x166   :  { %v1021_v12 = vadd.f32 %v1661_v5, %v1009_v6  ;;  %v1663_v13 = vadd.f32 %v928_v11, %v302_v57  ;;  %v930_v14 = vpop.f32.mrb[3].mxu0 }
 0x167   :  { %v1022_v15 = vadd.f32 %v1662_v10, %v1013_v8  ;;  %v1664_v16 = vadd.f32 %v930_v14, %v304_v58 }
 0x168   :  { %v1024_v17 = vadd.f32 %v1663_v13, %v1009_v6  ;;  %v1033_v19 = vmax.f32 %v1021_v12, 0.0 }
 0x169   :  { %v1025_v18 = vadd.f32 %v1664_v16, %v1013_v8  ;;  %v1034_v21 = vmax.f32 %v1022_v15, 0.0 }
 0x16a   :  { %v1036_v20 = vmax.f32 %v1024_v17, 0.0 }
 0x16b   :  { %v1037_v22 = vmax.f32 %v1025_v18, 0.0  ;;  %v934_v23 = vpop.f32.mrb[4].mxu0 }
 0x16c   :  { %v1045_v24 = vmax.f32 %v1033_v19, %v1036_v20  ;;  %v1665_v25 = vadd.f32 %v934_v23, %v308_v59  ;;  %v936_v26 = vpop.f32.mrb[5].mxu0 }
 0x16d   :  { %v1052_v27 = vmax.f32 %v1034_v21, %v1037_v22  ;;  %v1666_v28 = vadd.f32 %v936_v26, %v310_v60  ;;  %v938_v29 = vpop.f32.mrb[6].mxu0 }
 0x16e   :  { %v1046_v31 = vrot.slane %v1045_v24, 4  ;;  %v1027_v32 = vadd.f32 %v1665_v25, %v1009_v6  ;;  %v1667_v33 = vadd.f32 %v938_v29, %v312_v61  ;;  %v940_v2 = vpop.f32.mrb[7].mxu0 }
 0x16f   :  { %v1053_v34 = vrot.slane %v1052_v27, 4  ;;  %v1028_v35 = vadd.f32 %v1666_v28, %v1013_v8  ;;  %v1668_v36 = vadd.f32 %v940_v2, %v314_v62 }
 0x170   :  { %v1047_v37 = vmax.f32 %v1045_v24, %v1046_v31  ;;  %v1030_v38 = vadd.f32 %v1667_v33, %v1009_v6  ;;  %v1039_v43 = vmax.f32 %v1027_v32, 0.0 }
 0x171   :  { %v1054_v39 = vmax.f32 %v1052_v27, %v1053_v34  ;;  %v1031_v40 = vadd.f32 %v1668_v36, %v1013_v8  ;;  %v1040_v46 = vmax.f32 %v1028_v35, 0.0 }
 0x172   :  { %v1048_v42 = vrot.slane %v1047_v37, 2  ;;  %v1042_v44 = vmax.f32 %v1030_v38, 0.0 }
 0x173   :  { %v1055_v45 = vrot.slane %v1054_v39, 2  ;;  %v1043_v47 = vmax.f32 %v1031_v40, 0.0 }
 0x174   :  { %v1049_v48 = vmax.f32 %v1047_v37, %v1048_v42  ;;  %v1066_v49 = vmax.f32 %v1039_v43, %v1042_v44  ;;  %v1639_v50 = vpop.f32.mrb[8].mxu1 }
 0x175   :  { %v1056_v51 = vmax.f32 %v1054_v39, %v1055_v45  ;;  %v1073_v52 = vmax.f32 %v1040_v46, %v1043_v47  ;;  %v1029_v53 = vadd.f32 %v1639_v50, %v1017_v41  ;;  %v977_v54 = vpop.f32.mrb[9].mxu1  ;;  %v1525_v50 = vld [vmem:[%s2193_s4 + $0x3] ss:$0 sm:$0xff] }
 0x176   :  { %v1067_v55 = vrot.slane %v1066_v49, 4  ;;  %v1023_v56 = vadd.f32 %v1017_v41, %v977_v54  ;;  %v1640_v57 = vpop.f32.mrb[10].mxu1  ;;  %v1050_v61 = vrot.slane %v1049_v48, 1 }
 0x177   :  { %v1074_v58 = vrot.slane %v1073_v52, 4  ;;  %v1032_v59 = vadd.f32 %v1640_v57, %v1017_v41  ;;  %v980_v60 = vpop.f32.mrb[11].mxu1  ;;  %v1057_v0 = vrot.slane %v1056_v51, 1  ;;  %v1041_v3 = vmax.f32 %v1029_v53, 0.0 }
 0x178   :  { %v1068_v62 = vmax.f32 %v1066_v49, %v1067_v55  ;;  %v1026_v63 = vadd.f32 %v1017_v41, %v980_v60  ;;  %v1035_v7 = vmax.f32 %v1023_v56, 0.0  ;;  %v1051_v10 = vmax.f32 %v1049_v48, %v1050_v61 }
 0x179   :  { %v1075_v1 = vmax.f32 %v1073_v52, %v1074_v58  ;;  %v1044_v4 = vmax.f32 %v1032_v59, 0.0  ;;  %v1058_v15 = vmax.f32 %v1056_v51, %v1057_v0 }
 0x17a   :  { %v1069_v6 = vrot.slane %v1068_v62, 2  ;;  %v1038_v8 = vmax.f32 %v1026_v63, 0.0  ;;  %v1087_v20 = vpack.c.bf16 %v1051_v10, %v1051_v10 }
 0x17b   :  { %v1076_v5 = vrot.slane %v1075_v1, 2  ;;  %v1080_v9 = vmax.f32 %v1041_v3, %v1044_v4  ;;  %v1088_v25 = vpack.c.bf16 %v1058_v15, %v1058_v15 }
 0x17c   :  { %v1070_v11 = vmax.f32 %v1068_v62, %v1069_v6  ;;  %v1059_v12 = vmax.f32 %v1035_v7, %v1038_v8  ;;  %v1154_v30 = vunpack.c.l.b16 %v1087_v20 }
 0x17d   :  { %v1077_v13 = vmax.f32 %v1075_v1, %v1076_v5  ;;  %v1081_v14 = vrot.slane %v1080_v9, 4  ;;  %v1155_v2 = vunpack.c.l.b16 %v1088_v25 }
 0x17e   :  { %v1071_v16 = vrot.slane %v1070_v11, 1  ;;  %v1060_v17 = vrot.slane %v1059_v12, 4 }
 0x17f   :  { %v1078_v18 = vrot.slane %v1077_v13, 1  ;;  %v1082_v19 = vmax.f32 %v1080_v9, %v1081_v14 }
 0x180   :  { %v1072_v21 = vmax.f32 %v1070_v11, %v1071_v16  ;;  %v1061_v22 = vmax.f32 %v1059_v12, %v1060_v17 }
 0x181   :  { %v1083_v23 = vrot.slane %v1082_v19, 2  ;;  %v1079_v24 = vmax.f32 %v1077_v13, %v1078_v18 }
 0x182   :  { %v1090_v26 = vpack.c.bf16 %v1072_v21, %v1072_v21  ;;  %v1062_v27 = vrot.slane %v1061_v22, 2 }
 0x183   :  { %v1084_v28 = vmax.f32 %v1082_v19, %v1083_v23  ;;  %v1091_v29 = vpack.c.bf16 %v1079_v24, %v1079_v24 }
 0x184   :  { %v1157_v31 = vunpack.c.l.b16 %v1090_v26  ;;  %v1063_v32 = vmax.f32 %v1061_v22, %v1062_v27 }
 0x185   :  { %v1085_v33 = vrot.slane %v1084_v28, 1  ;;  %v1158_v34 = vunpack.c.l.b16 %v1091_v29 }
 0x186   :  { %v1064_v35 = vrot.slane %v1063_v32, 1  ;;  %v1161_v36 = vsel %vm1160_vm3, %v1157_v31, %v1154_v30 }
 0x187   :  { %v1086_v37 = vmax.f32 %v1084_v28, %v1085_v33  ;;  %v1162_v38 = vsel %vm1160_vm3, %v1158_v34, %v1155_v2  ;;  %v1164_v42 = vpack.c.b16 %v1161_v36, %v1161_v36 }
 0x188   :  { %v1065_v39 = vmax.f32 %v1063_v32, %v1064_v35  ;;  %v1165_v40 = vpack.c.b16 %v1162_v38, %v1162_v38 }
 0x189   :  { %v1092_v41 = vpack.c.bf16 %v1086_v37, %v1086_v37 }
 0x18a   :  { %v1089_v43 = vpack.c.bf16 %v1065_v39, %v1065_v39  ;;  %1346 = vmatprep.mubr.bf16.mxu1 %v1165_v40 }
 0x18b   :  { %v1159_v44 = vunpack.c.l.b16 %v1092_v41  ;;  %1347 = vmatmul.mubr.bf16.vlgmr.msra.gmra.mrb[12].mxu1 %v1164_v42 }
 0x18c   :  { %v1156_v45 = vunpack.c.l.b16 %v1089_v43 }
 0x18e   :  { %v1163_v46 = vsel %vm1160_vm3, %v1159_v44, %v1156_v45 }
 0x18f   :  { %v1166_v47 = vpack.c.b16 %v1163_v46, %v1163_v46 }
 0x191   :  { %1658 = vmatmul.mubr.bf16.vlgmr.msra.gmra.mrb[8].mxu0 %v1166_v47 }
 0x25e   :  { %v1586_v48 = vpop.f32.mrb[12].mxu1 }
 0x25f   :  { %v1587_v49 = vpop.f32.mrb[13].mxu1 }
 0x260   :  { %v1588_v51 = vadd.f32 %v1587_v49, %v1586_v48  ;;  %v1589_v52 = vpop.f32.mrb[14].mxu1 }
 0x261   :  { %v1590_v53 = vpop.f32.mrb[15].mxu1 }
 0x262   :  { %v1349_v54 = vadd.f32 %v1588_v51, %v1525_v50 }
 0x264   :  { %v1388_v55 = vpop.f32.mrb[8].mxu0 }
 0x265   :  { %v1389_v56 = vadd.f32 %v1388_v55, %v1349_v54  ;;  %v1659_v57 = vpop.f32.mrb[9].mxu0 }
 0x266   :  { %v1391_v58 = vpop.f32.mrb[10].mxu0 }
 0x267   :  { %1394 = vst [vmem:[#allocation10] sm:$0x3] %v1389_v56  ;;  %v1660_v59 = vpop.f32.mrb[11].mxu0 }
 0x268   :  { %1851 = shalt.err (!%p1848_p11)
}
 0x269   :  { %s1852_s2 = scalar_lea.hbm %s2194_s5, 32 }
 0x26a   :  { %p1853_p12 = scmp.ne.s32.totalorder %s2194_s5, %s1852_s2  ;;  %p1856_p13 = scmp.lt.u32.totalorder %s1852_s2, %s2194_s5 }
 0x26c   :  { %p1858_p0 = pnand %p1856_p13, %p1853_p12 }
 0x26e   :  { %1861 = shalt.err (!%p1858_p0)
}
 0x26f   :  { %1404 = dma.vmem_to_hbm [thread:$0]  %s1402_s9, 32, %s2194_s5, [#allocation5]  }
 0x270   :  { %1868 = dma.done.wait [#allocation5], 32  }
 0x271   :  { %1869 = vsyncadd [#allocation5], 4294967264 }
 0x272   :  { %1408 = vsyncpa [#allocation4], 1 }
 0x273   :  { %1409 = vsyncpa [#allocation9], 1 }
 0x274   :  { %1410 = vsyncpa [#allocation5], 1 }
 0x275   :  { %1411 = vsyncpa [#allocation6], 1 }

</bundles_post_ra>
